<compile_context>
chip_gen: v7x
topology: tpu7x:2x2x1
jax: 0.10.0
libtpu: 0.0.40
codegen_flags: <defaults>
</compile_context>

<pallas_src>
import math
from functools import partial

import jax
import jax.numpy as jnp
from jax.experimental import pallas as pl
from jax.experimental.pallas import tpu as pltpu

LANE = 128  # lane width: feature / hidden / class dims padded to this


# ---------------------------------------------------------------------------
# Small helpers
# ---------------------------------------------------------------------------
def _round_up(n, m):
    return (n + m - 1) // m * m


def _pad2d(a, rows, cols):
    return jnp.pad(a, ((0, rows - a.shape[0]), (0, cols - a.shape[1])))


def _vmem_capacity_bytes():
    """Per-core VMEM capacity; conservative 64 MiB (v7x) if the query fails."""
    try:
        info = pltpu.get_tpu_info()
        cap = getattr(info, "vmem_capacity_bytes", None)
        if cap:
            return int(cap)
    except Exception:
        pass
    return 64 * 1024 * 1024


def _plan_tiles(n):
    """Pick (tm, n_p, tk, vmem_cap).

    Prefer the largest row tile whose double-buffered adj row slab
    (2 * tm * n_p bf16) fits ~40% of this generation's VMEM, with the K axis
    collapsed (tk == n_p).  For very large graphs fall back to K-tiling the
    adj stream while keeping the support operand VMEM-resident.
    """
    cap = _vmem_capacity_bytes()
    budget = int(cap * 0.40)
    n128 = _round_up(n, LANE)
    for tm in (512, 384, 256, 128):
        if tm > n128:
            continue
        n_p = _round_up(n, tm)
        if 2 * tm * n_p * 2 <= budget:
            return tm, n_p, n_p, cap          # single-K: tk == n_p
    # Large-graph fallback: K-tile adj (triple-buffered), support resident.
    tm = 128
    tk = max(512, (budget // (3 * tm * 2)) // LANE * LANE)
    tk = min(tk, _round_up(n, LANE))
    n_p = _round_up(n, max(tm, tk))
    return tm, n_p, tk, cap


def _vmem_limit_bytes(n_p, tm, tk, nhid_p, nclass_p, cap):
    """Scoped VMEM limit sized from actual buffer need (+ headroom)."""
    nk = n_p // tk
    adj_buf = (2 if nk == 1 else 3) * tm * tk * 2            # bf16 adj stream
    resident = 2 * (n_p * max(nhid_p, nclass_p) + nhid_p * nclass_p) * 2
    out_buf = 2 * tm * nclass_p * 4
    misc = tm * max(nhid_p, nclass_p) * 4 + 4 * LANE * 4      # acc scratch etc.
    need = adj_buf + resident + out_buf + misc + (8 << 20)    # compiler slack
    return int(min(max(need, 32 << 20), cap - (4 << 20)))


# ---------------------------------------------------------------------------
# Kernel 1: row-tiled dense matmul   s1 = x @ W1   (bf16 MXU, f32 acc)
# ---------------------------------------------------------------------------
def _support_kernel(x_ref, w_ref, o_ref):
    o_ref[...] = jnp.dot(
        x_ref[...], w_ref[...], preferred_element_type=jnp.float32
    ).astype(o_ref.dtype)


def support_matmul(x, w, *, tm, vmem_limit):
    n_p, kdim = x.shape
    f = w.shape[1]
    return pl.pallas_call(
        _support_kernel,
        out_shape=jax.ShapeDtypeStruct((n_p, f), jnp.bfloat16),
        grid_spec=pltpu.PrefetchScalarGridSpec(
            num_scalar_prefetch=0,
            grid=(n_p // tm,),
            in_specs=[
                pl.BlockSpec((tm, kdim), lambda i: (i, 0)),
                pl.BlockSpec((kdim, f), lambda i: (0, 0)),   # W resident
            ],
            out_specs=pl.BlockSpec((tm, f), lambda i: (i, 0)),
        ),
        compiler_params=pltpu.CompilerParams(
            dimension_semantics=("parallel",),
            vmem_limit_bytes=vmem_limit,
        ),
    )(x, w)


# ---------------------------------------------------------------------------
# Kernel 2: fused GraphConvolution-1 + ReLU + layer-2 feature transform
#   out = relu(adj @ s1 + b1) @ W2        (dropout is identity in eval mode)
# ---------------------------------------------------------------------------
def _gc1_fused_kernel(adj_ref, s1_ref, b1_ref, w2_ref, o_ref, *scratch, nk, tk):
    def epilogue(acc):
        h = jnp.maximum(acc + b1_ref[...].astype(jnp.float32), 0.0)
        # TODO(synk): training-mode dropout (pltpu.prng_*) would go here.
        o_ref[...] = jnp.dot(
            h.astype(jnp.bfloat16), w2_ref[...],
            preferred_element_type=jnp.float32,
        ).astype(o_ref.dtype)

    if nk == 1:
        epilogue(jnp.dot(adj_ref[...], s1_ref[...],
                         preferred_element_type=jnp.float32))
    else:
        acc_ref = scratch[0]
        k = pl.program_id(1)

        @pl.when(k == 0)
        def _():
            acc_ref[...] = jnp.zeros_like(acc_ref)

        off = pl.multiple_of(k * tk, tk)
        acc_ref[...] += jnp.dot(adj_ref[...], s1_ref[pl.ds(off, tk), :],
                                preferred_element_type=jnp.float32)

        @pl.when(k == nk - 1)
        def _():
            epilogue(acc_ref[...])


# ---------------------------------------------------------------------------
# Kernel 3: GraphConvolution-2 + masked log_softmax
#   out = log_softmax(adj @ s2 + b2)   (padded class columns masked, f32)
# ---------------------------------------------------------------------------
def _gc2_kernel(adj_ref, s2_ref, b2_ref, o_ref, *scratch, nk, tk, valid_cols):
    def epilogue(acc):
        z = acc + b2_ref[...].astype(jnp.float32)
        col = jax.lax.broadcasted_iota(jnp.int32, z.shape, 1)
        z = jnp.where(col < valid_cols, z, jnp.float32(-1e30))
        m = jnp.max(z, axis=-1, keepdims=True)
        s = z - m
        lse = jnp.log(jnp.sum(jnp.exp(s), axis=-1, keepdims=True))
        o_ref[...] = (s - lse).astype(o_ref.dtype)

    if nk == 1:
        epilogue(jnp.dot(adj_ref[...], s2_ref[...],
                         preferred_element_type=jnp.float32))
    else:
        acc_ref = scratch[0]
        k = pl.program_id(1)

        @pl.when(k == 0)
        def _():
            acc_ref[...] = jnp.zeros_like(acc_ref)

        off = pl.multiple_of(k * tk, tk)
        acc_ref[...] += jnp.dot(adj_ref[...], s2_ref[pl.ds(off, tk), :],
                                preferred_element_type=jnp.float32)

        @pl.when(k == nk - 1)
        def _():
            epilogue(acc_ref[...])


# ---------------------------------------------------------------------------
# Shared builder for the two graph-aggregation kernels
# ---------------------------------------------------------------------------
def _graph_conv_call(kernel_body, adj, support, operands, *, out_cols,
                     out_dtype, acc_cols, tm, tk, vmem_limit, static_kwargs):
    n_p = adj.shape[0]
    nm, nk = n_p // tm, n_p // tk

    if nk == 1:
        grid = (nm,)
        adj_spec = pl.BlockSpec((tm, n_p), lambda i: (i, 0))
        out_spec = pl.BlockSpec((tm, out_cols), lambda i: (i, 0))
        const = lambda shape: pl.BlockSpec(shape, lambda i: (0, 0))
        scratch = ()
        sem = ("parallel",)
    else:
        grid = (nm, nk)
        adj_spec = pl.BlockSpec((tm, tk), lambda i, k: (i, k),
                                pipeline_mode=pl.Buffered(3))
        out_spec = pl.BlockSpec((tm, out_cols), lambda i, k: (i, 0))
        const = lambda shape: pl.BlockSpec(shape, lambda i, k: (0, 0))
        scratch = (pltpu.VMEM((tm, acc_cols), jnp.float32),)
        sem = ("parallel", "arbitrary")

    in_specs = [adj_spec, const(support.shape)]
    in_specs += [const(op.shape) for op in operands]

    kernel = partial(kernel_body, nk=nk, tk=tk, **static_kwargs)
    return pl.pallas_call(
        kernel,
        out_shape=jax.ShapeDtypeStruct((n_p, out_cols), out_dtype),
        grid_spec=pltpu.PrefetchScalarGridSpec(
            num_scalar_prefetch=0,
            grid=grid,
            in_specs=in_specs,
            out_specs=out_spec,
            scratch_shapes=scratch,
        ),
        compiler_params=pltpu.CompilerParams(
            dimension_semantics=sem,
            vmem_limit_bytes=vmem_limit,
        ),
    )(adj, support, *operands)


# ---------------------------------------------------------------------------
# Jitted forward (all padding/casts of adj + weights already done outside)
# ---------------------------------------------------------------------------
def _gcn_forward_impl(x, adj_p, w1_p, b1_p, w2_p, b2_p, *,
                      tm, tk, n_p, nfeat_p, vmem_limit, nclass):
    # Only x is padded per call (cheap: N x nfeat).
    x_p = _pad2d(x, n_p, nfeat_p).astype(jnp.bfloat16)

    # s1 = x @ W1
    s1 = support_matmul(x_p, w1_p, tm=tm, vmem_limit=vmem_limit)

    # s2 = relu(adj @ s1 + b1) @ W2      (layer-1 conv fused with layer-2 lift)
    s2 = _graph_conv_call(
        _gc1_fused_kernel, adj_p, s1, [b1_p, w2_p],
        out_cols=w2_p.shape[1], out_dtype=jnp.bfloat16,
        acc_cols=s1.shape[1], tm=tm, tk=tk,
        vmem_limit=vmem_limit, static_kwargs={})

    # out = log_softmax(adj @ s2 + b2)   (padded class columns masked, f32)
    out_p = _graph_conv_call(
        _gc2_kernel, adj_p, s2, [b2_p],
        out_cols=w2_p.shape[1], out_dtype=jnp.float32,
        acc_cols=w2_p.shape[1], tm=tm, tk=tk,
        vmem_limit=vmem_limit, static_kwargs=dict(valid_cols=nclass))
    return out_p


class GCNPallas:
    """Eval-mode pygcn GCN forward on TPU.  adj / weights are padded and cast
    to bf16 once at construction (hoisted out of the jitted per-call path)."""

    def __init__(self, adj, w1, b1, w2, b2, dropout=0.5):
        n = adj.shape[0]
        nfeat, nhid = w1.shape
        nclass = w2.shape[1]

        tm, n_p, tk, cap = _plan_tiles(n)
        nfeat_p = _round_up(nfeat, LANE)
        nhid_p = _round_up(nhid, LANE)
        nclass_p = _round_up(nclass, LANE)
        vmem_limit = _vmem_limit_bytes(n_p, tm, tk, nhid_p, nclass_p, cap)

        # One-time padding + bf16 casts (outside the jitted forward).
        self.adj_p = _pad2d(adj, n_p, n_p).astype(jnp.bfloat16)
        self.w1_p = _pad2d(w1, nfeat_p, nhid_p).astype(jnp.bfloat16)
        self.w2_p = _pad2d(w2, nhid_p, nclass_p).astype(jnp.bfloat16)
        self.b1_p = _pad2d(b1, 1, nhid_p).astype(jnp.float32)
        self.b2_p = _pad2d(b2, 1, nclass_p).astype(jnp.float32)

        self._n = n
        self._nclass = nclass
        self.dropout = dropout  # identity in eval mode (training=False)
        self._fwd = jax.jit(partial(
            _gcn_forward_impl, tm=tm, tk=tk, n_p=n_p, nfeat_p=nfeat_p,
            vmem_limit=vmem_limit, nclass=nclass))

    def __call__(self, x):
        out_p = self._fwd(x, self.adj_p, self.w1_p, self.b1_p,
                          self.w2_p, self.b2_p)
        return out_p[:self._n, :self._nclass]


# ---------------------------------------------------------------------------
# Reference (pure JAX, f32) and deterministic input builders
# ---------------------------------------------------------------------------
def gcn_reference(x, adj, w1, b1, w2, b2):
    h = jnp.maximum(adj @ (x @ w1) + b1, 0.0)
    z = adj @ (h @ w2) + b2
    return jax.nn.log_softmax(z, axis=1)


def init_gcn_params(key, nfeat, nhid, nclass):
    """Mimics pygcn GraphConvolution.reset_parameters:
    uniform(-stdv, stdv), stdv = 1/sqrt(out_features)."""
    k1, k2, k3, k4 = jax.random.split(key, 4)
    stdv1 = 1.0 / math.sqrt(nhid)
    stdv2 = 1.0 / math.sqrt(nclass)
    w1 = jax.random.uniform(k1, (nfeat, nhid), jnp.float32, -stdv1, stdv1)
    b1 = jax.random.uniform(k2, (1, nhid), jnp.float32, -stdv1, stdv1)
    w2 = jax.random.uniform(k3, (nhid, nclass), jnp.float32, -stdv2, stdv2)
    b2 = jax.random.uniform(k4, (1, nclass), jnp.float32, -stdv2, stdv2)
    return w1, b1, w2, b2


def make_normalized_adj(key, n):
    """Random symmetric adjacency with self-loops, symmetrically normalized
    (D^-1/2 (A+I) D^-1/2), as pygcn preprocesses it."""
    a = (jax.random.uniform(key, (n, n)) < 0.05).astype(jnp.float32)
    a = jnp.maximum(a, a.T)
    a = a + jnp.eye(n, dtype=jnp.float32)
    d = jnp.sum(a, axis=1)
    d_inv_sqrt = 1.0 / jnp.sqrt(d)
    return a * d_inv_sqrt[:, None] * d_inv_sqrt[None, :]


if __name__ == "__main__":
    # Small but representative shapes (whole graph fits a single row tile,
    # so the fast single-K / resident-support path is exercised).
    N, NFEAT, NHID, NCLASS = 256, 64, 32, 16

    key = jax.random.PRNGKey(0)
    kx, kadj, kp = jax.random.split(key, 3)

    x = jax.random.normal(kx, (N, NFEAT), dtype=jnp.float32)
    adj = make_normalized_adj(kadj, N)
    w1, b1, w2, b2 = init_gcn_params(kp, NFEAT, NHID, NCLASS)

    model = GCNPallas(adj, w1, b1, w2, b2, dropout=0.5)
    out = model(x)
    jax.block_until_ready(out)

    assert out.shape == (N, NCLASS)

    # log_softmax rows exponentiate-sum to ~1.
    row_sums = jnp.sum(jnp.exp(out), axis=1)
    assert bool(jnp.all(jnp.abs(row_sums - 1.0) < 1e-4))

    # Loose agreement with an f32 pure-JAX reference (bf16 MXU operands).
    ref = gcn_reference(x, adj, w1, b1, w2, b2)
    assert bool(jnp.max(jnp.abs(out - ref)) < 0.2)

    print("KERNEL_OK")
</pallas_src>

<mosaic_0001>
module attributes {stable_mosaic.version = 11 : i64} {
  func.func @_support_kernel(%arg0: i32, %arg1: memref<256x128xbf16, #tpu.memory_space<vmem>>, %arg2: memref<128x128xbf16, #tpu.memory_space<vmem>>, %arg3: memref<256x128xbf16, #tpu.memory_space<vmem>>) attributes {dimension_semantics = [#tpu.dimension_semantics<parallel>], iteration_bounds = array<i64: 1>, scalar_prefetch = 0 : i64, scratch_operands = 0 : i64, tpu.core_type = #tpu.core_type<tc>, window_params = [{transform_indices = @transform_0, window_bounds = array<i64: 256, 128>}, {pipeline_mode = #tpu.pipeline_mode<synchronous>, transform_indices = @transform_1, window_bounds = array<i64: 128, 128>}, {transform_indices = @transform_2, window_bounds = array<i64: 256, 128>}]} {
    %c0 = arith.constant 0 : index
    %c0_0 = arith.constant 0 : index
    %0 = vector.load %arg1[%c0, %c0_0] : memref<256x128xbf16, #tpu.memory_space<vmem>>, vector<256x128xbf16>
    %c0_1 = arith.constant 0 : index
    %c0_2 = arith.constant 0 : index
    %1 = vector.load %arg2[%c0_1, %c0_2] : memref<128x128xbf16, #tpu.memory_space<vmem>>, vector<128x128xbf16>
    %cst = arith.constant dense<0.000000e+00> : vector<256x128xf32>
    %2 = tpu.matmul %0, %1, %cst {dimension_numbers = #tpu.dot_dimension_numbers<[1], [0], [0], [1], [0, 0, 1, 1], [], []>} : vector<256x128xbf16>, vector<128x128xbf16>, vector<256x128xf32> -> vector<256x128xf32>
    %3 = arith.truncf %2 : vector<256x128xf32> to vector<256x128xbf16>
    %c0_3 = arith.constant 0 : index
    %c0_4 = arith.constant 0 : index
    %4 = vector.load %arg3[%c0_3, %c0_4] : memref<256x128xbf16, #tpu.memory_space<vmem>>, vector<256x128xbf16>
    tpu.vector_store %arg3[%c0_3, %c0_4], %3 {strides = array<i32>} : memref<256x128xbf16, #tpu.memory_space<vmem>>, vector<256x128xbf16>,
    return
  }
  func.func @transform_0(%arg0: i32) -> (i32, i32) {
    %c0_i32 = arith.constant 0 : i32
    %c0_i32_0 = arith.constant 0 : i32
    return %arg0, %c0_i32 : i32, i32
  }
  func.func @transform_1(%arg0: i32) -> (i32, i32) {
    %c0_i32 = arith.constant 0 : i32
    %c0_i32_0 = arith.constant 0 : i32
    %c0_i32_1 = arith.constant 0 : i32
    return %c0_i32, %c0_i32_0 : i32, i32
  }
  func.func @transform_2(%arg0: i32) -> (i32, i32) {
    %c0_i32 = arith.constant 0 : i32
    %c0_i32_0 = arith.constant 0 : i32
    return %arg0, %c0_i32 : i32, i32
  }
}

module attributes {stable_mosaic.version = 11 : i64} {
  func.func @_gc1_fused_kernel(%arg0: i32, %arg1: memref<256x256xbf16, #tpu.memory_space<vmem>>, %arg2: memref<256x128xbf16, #tpu.memory_space<vmem>>, %arg3: memref<1x128xf32, #tpu.memory_space<vmem>>, %arg4: memref<128x128xbf16, #tpu.memory_space<vmem>>, %arg5: memref<256x128xbf16, #tpu.memory_space<vmem>>) attributes {dimension_semantics = [#tpu.dimension_semantics<parallel>], iteration_bounds = array<i64: 1>, scalar_prefetch = 0 : i64, scratch_operands = 0 : i64, tpu.core_type = #tpu.core_type<tc>, window_params = [{transform_indices = @transform_0, window_bounds = array<i64: 256, 256>}, {pipeline_mode = #tpu.pipeline_mode<synchronous>, transform_indices = @transform_1, window_bounds = array<i64: 256, 128>}, {pipeline_mode = #tpu.pipeline_mode<synchronous>, transform_indices = @transform_2, window_bounds = array<i64: 1, 128>}, {pipeline_mode = #tpu.pipeline_mode<synchronous>, transform_indices = @transform_3, window_bounds = array<i64: 128, 128>}, {transform_indices = @transform_4, window_bounds = array<i64: 256, 128>}]} {
    %c0 = arith.constant 0 : index
    %c0_0 = arith.constant 0 : index
    %0 = vector.load %arg1[%c0, %c0_0] : memref<256x256xbf16, #tpu.memory_space<vmem>>, vector<256x256xbf16>
    %c0_1 = arith.constant 0 : index
    %c0_2 = arith.constant 0 : index
    %1 = vector.load %arg2[%c0_1, %c0_2] : memref<256x128xbf16, #tpu.memory_space<vmem>>, vector<256x128xbf16>
    %cst = arith.constant dense<0.000000e+00> : vector<256x128xf32>
    %2 = tpu.matmul %0, %1, %cst {dimension_numbers = #tpu.dot_dimension_numbers<[1], [0], [0], [1], [0, 0, 1, 1], [], []>} : vector<256x256xbf16>, vector<256x128xbf16>, vector<256x128xf32> -> vector<256x128xf32>
    %c0_3 = arith.constant 0 : index
    %c0_4 = arith.constant 0 : index
    %3 = vector.load %arg3[%c0_3, %c0_4] : memref<1x128xf32, #tpu.memory_space<vmem>>, vector<1x128xf32>
    %4 = vector.broadcast %3 : vector<1x128xf32> to vector<256x128xf32>
    %5 = arith.addf %2, %4 : vector<256x128xf32>
    %cst_5 = arith.constant 0.000000e+00 : f32
    %6 = vector.broadcast %cst_5 : f32 to vector<256x128xf32>
    %7 = arith.maximumf %5, %6 : vector<256x128xf32>
    %8 = arith.truncf %7 : vector<256x128xf32> to vector<256x128xbf16>
    %c0_6 = arith.constant 0 : index
    %c0_7 = arith.constant 0 : index
    %9 = vector.load %arg4[%c0_6, %c0_7] : memref<128x128xbf16, #tpu.memory_space<vmem>>, vector<128x128xbf16>
    %cst_8 = arith.constant dense<0.000000e+00> : vector<256x128xf32>
    %10 = tpu.matmul %8, %9, %cst_8 {dimension_numbers = #tpu.dot_dimension_numbers<[1], [0], [0], [1], [0, 0, 1, 1], [], []>} : vector<256x128xbf16>, vector<128x128xbf16>, vector<256x128xf32> -> vector<256x128xf32>
    %11 = arith.truncf %10 : vector<256x128xf32> to vector<256x128xbf16>
    %c0_9 = arith.constant 0 : index
    %c0_10 = arith.constant 0 : index
    %12 = vector.load %arg5[%c0_9, %c0_10] : memref<256x128xbf16, #tpu.memory_space<vmem>>, vector<256x128xbf16>
    tpu.vector_store %arg5[%c0_9, %c0_10], %11 {strides = array<i32>} : memref<256x128xbf16, #tpu.memory_space<vmem>>, vector<256x128xbf16>,
    return
  }
  func.func @transform_0(%arg0: i32) -> (i32, i32) {
    %c0_i32 = arith.constant 0 : i32
    %c0_i32_0 = arith.constant 0 : i32
    return %arg0, %c0_i32 : i32, i32
  }
  func.func @transform_1(%arg0: i32) -> (i32, i32) {
    %c0_i32 = arith.constant 0 : i32
    %c0_i32_0 = arith.constant 0 : i32
    %c0_i32_1 = arith.constant 0 : i32
    return %c0_i32, %c0_i32_0 : i32, i32
  }
  func.func @transform_2(%arg0: i32) -> (i32, i32) {
    %c0_i32 = arith.constant 0 : i32
    %c0_i32_0 = arith.constant 0 : i32
    %c0_i32_1 = arith.constant 0 : i32
    return %c0_i32, %c0_i32_0 : i32, i32
  }
  func.func @transform_3(%arg0: i32) -> (i32, i32) {
    %c0_i32 = arith.constant 0 : i32
    %c0_i32_0 = arith.constant 0 : i32
    %c0_i32_1 = arith.constant 0 : i32
    return %c0_i32, %c0_i32_0 : i32, i32
  }
  func.func @transform_4(%arg0: i32) -> (i32, i32) {
    %c0_i32 = arith.constant 0 : i32
    %c0_i32_0 = arith.constant 0 : i32
    return %arg0, %c0_i32 : i32, i32
  }
}

module attributes {stable_mosaic.version = 11 : i64} {
  func.func @_gc2_kernel(%arg0: i32, %arg1: memref<256x256xbf16, #tpu.memory_space<vmem>>, %arg2: memref<256x128xbf16, #tpu.memory_space<vmem>>, %arg3: memref<1x128xf32, #tpu.memory_space<vmem>>, %arg4: memref<256x128xf32, #tpu.memory_space<vmem>>) attributes {dimension_semantics = [#tpu.dimension_semantics<parallel>], iteration_bounds = array<i64: 1>, scalar_prefetch = 0 : i64, scratch_operands = 0 : i64, tpu.core_type = #tpu.core_type<tc>, window_params = [{transform_indices = @transform_0, window_bounds = array<i64: 256, 256>}, {pipeline_mode = #tpu.pipeline_mode<synchronous>, transform_indices = @transform_1, window_bounds = array<i64: 256, 128>}, {pipeline_mode = #tpu.pipeline_mode<synchronous>, transform_indices = @transform_2, window_bounds = array<i64: 1, 128>}, {transform_indices = @transform_3, window_bounds = array<i64: 256, 128>}]} {
    %c0 = arith.constant 0 : index
    %c0_0 = arith.constant 0 : index
    %0 = vector.load %arg1[%c0, %c0_0] : memref<256x256xbf16, #tpu.memory_space<vmem>>, vector<256x256xbf16>
    %c0_1 = arith.constant 0 : index
    %c0_2 = arith.constant 0 : index
    %1 = vector.load %arg2[%c0_1, %c0_2] : memref<256x128xbf16, #tpu.memory_space<vmem>>, vector<256x128xbf16>
    %cst = arith.constant dense<0.000000e+00> : vector<256x128xf32>
    %2 = tpu.matmul %0, %1, %cst {dimension_numbers = #tpu.dot_dimension_numbers<[1], [0], [0], [1], [0, 0, 1, 1], [], []>} : vector<256x256xbf16>, vector<256x128xbf16>, vector<256x128xf32> -> vector<256x128xf32>
    %c0_3 = arith.constant 0 : index
    %c0_4 = arith.constant 0 : index
    %3 = vector.load %arg3[%c0_3, %c0_4] : memref<1x128xf32, #tpu.memory_space<vmem>>, vector<1x128xf32>
    %4 = vector.broadcast %3 : vector<1x128xf32> to vector<256x128xf32>
    %5 = arith.addf %2, %4 : vector<256x128xf32>
    %6 = tpu.iota {dimensions = array<i32: 1>} : vector<256x128xi32>
    %c16_i32 = arith.constant 16 : i32
    %7 = vector.broadcast %c16_i32 : i32 to vector<256x128xi32>
    %8 = arith.cmpi slt, %6, %7 : vector<256x128xi32>
    %cst_5 = arith.constant -1.000000e+30 : f32
    %9 = vector.broadcast %cst_5 : f32 to vector<256x128xf32>
    %10 = arith.select %8, %5, %9 : vector<256x128xi1>, vector<256x128xf32>
    %cst_6 = arith.constant dense<0xFF800000> : vector<256xf32>
    %11 = vector.multi_reduction <maximumf>, %10, %cst_6 [1] : vector<256x128xf32> to vector<256xf32>
    %12 = vector.shape_cast %11 : vector<256xf32> to vector<256x1xf32>
    %13 = vector.broadcast %12 : vector<256x1xf32> to vector<256x128xf32>
    %14 = arith.subf %10, %13 : vector<256x128xf32>
    %15 = math.exp %14 : vector<256x128xf32>
    %cst_7 = arith.constant dense<0.000000e+00> : vector<256xf32>
    %16 = vector.multi_reduction <add>, %15, %cst_7 [1] : vector<256x128xf32> to vector<256xf32>
    %17 = vector.shape_cast %16 : vector<256xf32> to vector<256x1xf32>
    %18 = math.log %17 : vector<256x1xf32>
    %19 = vector.broadcast %18 : vector<256x1xf32> to vector<256x128xf32>
    %20 = arith.subf %14, %19 : vector<256x128xf32>
    %c0_8 = arith.constant 0 : index
    %c0_9 = arith.constant 0 : index
    %21 = vector.load %arg4[%c0_8, %c0_9] : memref<256x128xf32, #tpu.memory_space<vmem>>, vector<256x128xf32>
    tpu.vector_store %arg4[%c0_8, %c0_9], %20 {strides = array<i32>} : memref<256x128xf32, #tpu.memory_space<vmem>>, vector<256x128xf32>,
    return
  }
  func.func @transform_0(%arg0: i32) -> (i32, i32) {
    %c0_i32 = arith.constant 0 : i32
    %c0_i32_0 = arith.constant 0 : i32
    return %arg0, %c0_i32 : i32, i32
  }
  func.func @transform_1(%arg0: i32) -> (i32, i32) {
    %c0_i32 = arith.constant 0 : i32
    %c0_i32_0 = arith.constant 0 : i32
    %c0_i32_1 = arith.constant 0 : i32
    return %c0_i32, %c0_i32_0 : i32, i32
  }
  func.func @transform_2(%arg0: i32) -> (i32, i32) {
    %c0_i32 = arith.constant 0 : i32
    %c0_i32_0 = arith.constant 0 : i32
    %c0_i32_1 = arith.constant 0 : i32
    return %c0_i32, %c0_i32_0 : i32, i32
  }
  func.func @transform_3(%arg0: i32) -> (i32, i32) {
    %c0_i32 = arith.constant 0 : i32
    %c0_i32_0 = arith.constant 0 : i32
    return %arg0, %c0_i32 : i32, i32
  }
}

</mosaic_0001>

<bundles_post_ra>
// kernel: _gcn_forward_impl.3
= control target key start
LH: loop header
LB: loop body
LE: loop exit
PB: predicated region body
PF: predicated region fallthrough
CT: control target
= control target key end

     0   :  { %s959_s1 = inlined_call_operand.vmem [shape: bf16[128,128], index: 1, kind: input, shape index: {}]   ;;  %s960_s0 = inlined_call_operand.vmem [shape: bf16[256,128], index: 0, kind: input, shape index: {}]   ;;  %s961_s2 = inlined_call_operand.vmem [shape: bf16[256,128], index: 2, kind: output, shape index: {}]  }
   0x1   :  { %v800_v0 = vld [vmem:[%s959_s1] sm:$0xff]   ;;  %v801_v1 = vld [vmem:[%s959_s1 + $0x8] sm:$0xff]   ;;  %v802_v2 = vld [vmem:[%s959_s1 + $0x10] sm:$0xff]  }
   0x2   :  { %736 = vmatprep.subr.bf16.mxu0 %v800_v0  ;;  %784 = vmatprep.subr.bf16.mxu1 %v800_v0  ;;  %v803_v3 = vld [vmem:[%s959_s1 + $0x18] sm:$0xff]   ;;  %v808_v4 = vld [vmem:[%s960_s0] sm:$0xff]   ;;  %v805_v7 = vld [vmem:[%s959_s1 + $0x28] sm:$0xff]  }
   0x3   :  { %737 = vmatpush3.bf16.msra.mxu0 %v800_v0  ;;  %792 = vmatpush3.bf16.msra.mxu1 %v800_v0  ;;  %v809_v5 = vld [vmem:[%s960_s0 + $0x40] sm:$0xff]   ;;  %v806_v8 = vld [vmem:[%s959_s1 + $0x30] sm:$0xff]   ;;  %v807_v9 = vld [vmem:[%s959_s1 + $0x38] sm:$0xff]  }
   0x4   :  { %738 = vmatprep.subr.bf16.mxu0 %v801_v1  ;;  %785 = vmatprep.subr.bf16.mxu1 %v801_v1  ;;  %v804_v6 = vld [vmem:[%s959_s1 + $0x20] sm:$0xff]   ;;  %v810_v10 = vld [vmem:[%s960_s0 + $0x8] sm:$0xff]   ;;  %v812_v12 = vld [vmem:[%s960_s0 + $0x10] sm:$0xff]  }
   0x5   :  { %752 = vmatprep.mubr.bf16.mxu0 %v808_v4  ;;  %768 = vmatprep.mubr.bf16.mxu1 %v809_v5  ;;  %v811_v11 = vld [vmem:[%s960_s0 + $0x48] sm:$0xff]   ;;  %v813_v13 = vld [vmem:[%s960_s0 + $0x50] sm:$0xff]   ;;  %v814_v14 = vld [vmem:[%s960_s0 + $0x18] sm:$0xff]  }
   0x6   :  { %v815_v15 = vld [vmem:[%s960_s0 + $0x58] sm:$0xff]   ;;  %v816_v16 = vld [vmem:[%s960_s0 + $0x20] sm:$0xff]   ;;  %v818_v18 = vld [vmem:[%s960_s0 + $0x28] sm:$0xff]  }
   0x7   :  { %739 = vmatpush3.bf16.msra.mxu0 %v801_v1  ;;  %793 = vmatpush3.bf16.msra.mxu1 %v801_v1  ;;  %v817_v17 = vld [vmem:[%s960_s0 + $0x60] sm:$0xff]   ;;  %v819_v19 = vld [vmem:[%s960_s0 + $0x68] sm:$0xff]   ;;  %v820_v20 = vld [vmem:[%s960_s0 + $0x30] sm:$0xff]  }
   0x8   :  { %740 = vmatprep.subr.bf16.mxu0 %v802_v2  ;;  %786 = vmatprep.subr.bf16.mxu1 %v802_v2  ;;  %v821_v21 = vld [vmem:[%s960_s0 + $0x70] sm:$0xff]   ;;  %v822_v22 = vld [vmem:[%s960_s0 + $0x38] sm:$0xff]  }
   0x9   :  { %v823_v23 = vld [vmem:[%s960_s0 + $0x78] sm:$0xff]  }
   0xb   :  { %741 = vmatpush3.bf16.msra.mxu0 %v802_v2  ;;  %794 = vmatpush3.bf16.msra.mxu1 %v802_v2 }
   0xc   :  { %742 = vmatprep.subr.bf16.mxu0 %v803_v3  ;;  %787 = vmatprep.subr.bf16.mxu1 %v803_v3 }
   0xf   :  { %743 = vmatpush3.bf16.msra.mxu0 %v803_v3  ;;  %795 = vmatpush3.bf16.msra.mxu1 %v803_v3 }
  0x10   :  { %744 = vmatprep.subr.bf16.mxu0 %v804_v6  ;;  %788 = vmatprep.subr.bf16.mxu1 %v804_v6 }
  0x13   :  { %745 = vmatpush3.bf16.msra.mxu0 %v804_v6  ;;  %796 = vmatpush3.bf16.msra.mxu1 %v804_v6 }
  0x14   :  { %746 = vmatprep.subr.bf16.mxu0 %v805_v7  ;;  %789 = vmatprep.subr.bf16.mxu1 %v805_v7 }
  0x17   :  { %747 = vmatpush3.bf16.msra.mxu0 %v805_v7  ;;  %797 = vmatpush3.bf16.msra.mxu1 %v805_v7 }
  0x18   :  { %748 = vmatprep.subr.bf16.mxu0 %v806_v8  ;;  %790 = vmatprep.subr.bf16.mxu1 %v806_v8 }
  0x1b   :  { %749 = vmatpush3.bf16.msra.mxu0 %v806_v8  ;;  %798 = vmatpush3.bf16.msra.mxu1 %v806_v8 }
  0x1c   :  { %750 = vmatprep.subr.bf16.mxu0 %v807_v9  ;;  %791 = vmatprep.subr.bf16.mxu1 %v807_v9 }
  0x1f   :  { %751 = vmatpush3.bf16.msra.mxu0 %v807_v9  ;;  %799 = vmatpush3.bf16.msra.mxu1 %v807_v9 }
  0x22   :  { %753 = vmatmul.mubr.bf16.vlgmr.msra.gmra.mrb[0].mxu0 %v810_v10  ;;  %769 = vmatmul.mubr.bf16.vlgmr.msra.gmra.mrb[0].mxu1 %v811_v11 }
  0x23   :  { %756 = vmatprep.mubr.bf16.mxu0 %v812_v12  ;;  %772 = vmatprep.mubr.bf16.mxu1 %v813_v13 }
  0x2a   :  { %757 = vmatmul.mubr.bf16.gmra.mrb[4].mxu0 %v814_v14  ;;  %773 = vmatmul.mubr.bf16.gmra.mrb[4].mxu1 %v815_v15 }
  0x2b   :  { %760 = vmatprep.mubr.bf16.mxu0 %v816_v16  ;;  %776 = vmatprep.mubr.bf16.mxu1 %v817_v17 }
  0x32   :  { %761 = vmatmul.mubr.bf16.gmra.mrb[8].mxu0 %v818_v18  ;;  %777 = vmatmul.mubr.bf16.gmra.mrb[8].mxu1 %v819_v19 }
  0x33   :  { %764 = vmatprep.mubr.bf16.mxu0 %v820_v20  ;;  %780 = vmatprep.mubr.bf16.mxu1 %v821_v21 }
  0x3a   :  { %765 = vmatmul.mubr.bf16.gmra.mrb[12].mxu0 %v822_v22  ;;  %781 = vmatmul.mubr.bf16.gmra.mrb[12].mxu1 %v823_v23 }
  0xf5   :  { %v754_v24 = vpop.f32.mrb[0].mxu0  ;;  %v770_v25 = vpop.f32.mrb[0].mxu1 }
  0xf6   :  { %v238_v26 = vpop.f32.mrb[1].mxu0  ;;  %v302_v27 = vpop.f32.mrb[1].mxu1 }
  0xf7   :  { %v755_v28 = vpop.f32.mrb[2].mxu0  ;;  %v771_v29 = vpop.f32.mrb[2].mxu1 }
  0xf8   :  { %v625_v30 = vpack.c.bf16 %v755_v28, %v754_v24  ;;  %v665_v31 = vpack.c.bf16 %v771_v29, %v770_v25  ;;  %v241_v32 = vpop.f32.mrb[3].mxu0  ;;  %v305_v33 = vpop.f32.mrb[3].mxu1 }
  0xf9   :  { %v620_v34 = vpack.c.bf16 %v241_v32, %v238_v26  ;;  %v660_v35 = vpack.c.bf16 %v305_v33, %v302_v27 }
  0xfa   :  { %697 = vst [vmem:[%s961_s2 + $0x8] sm:$0xff] %v625_v30   ;;  %705 = vst [vmem:[%s961_s2 + $0x48] sm:$0xff] %v665_v31  }
  0xfb   :  { %621 = vst [vmem:[%s961_s2] sm:$0xff] %v620_v34   ;;  %704 = vst [vmem:[%s961_s2 + $0x40] sm:$0xff] %v660_v35  }
  0xfd   :  { %v758_v36 = vpop.f32.mrb[4].mxu0  ;;  %v774_v37 = vpop.f32.mrb[4].mxu1 }
  0xfe   :  { %v254_v38 = vpop.f32.mrb[5].mxu0  ;;  %v318_v39 = vpop.f32.mrb[5].mxu1 }
  0xff   :  { %v759_v40 = vpop.f32.mrb[6].mxu0  ;;  %v775_v41 = vpop.f32.mrb[6].mxu1 }
 0x100   :  { %v635_v42 = vpack.c.bf16 %v759_v40, %v758_v36  ;;  %v675_v43 = vpack.c.bf16 %v775_v41, %v774_v37  ;;  %v257_v44 = vpop.f32.mrb[7].mxu0  ;;  %v321_v45 = vpop.f32.mrb[7].mxu1 }
 0x101   :  { %v630_v46 = vpack.c.bf16 %v257_v44, %v254_v38  ;;  %v670_v47 = vpack.c.bf16 %v321_v45, %v318_v39 }
 0x102   :  { %699 = vst [vmem:[%s961_s2 + $0x18] sm:$0xff] %v635_v42   ;;  %707 = vst [vmem:[%s961_s2 + $0x58] sm:$0xff] %v675_v43  }
 0x103   :  { %698 = vst [vmem:[%s961_s2 + $0x10] sm:$0xff] %v630_v46   ;;  %706 = vst [vmem:[%s961_s2 + $0x50] sm:$0xff] %v670_v47  }
 0x105   :  { %v762_v48 = vpop.f32.mrb[8].mxu0  ;;  %v778_v49 = vpop.f32.mrb[8].mxu1 }
 0x106   :  { %v270_v50 = vpop.f32.mrb[9].mxu0  ;;  %v334_v51 = vpop.f32.mrb[9].mxu1 }
 0x107   :  { %v763_v52 = vpop.f32.mrb[10].mxu0  ;;  %v779_v53 = vpop.f32.mrb[10].mxu1 }
 0x108   :  { %v645_v54 = vpack.c.bf16 %v763_v52, %v762_v48  ;;  %v685_v55 = vpack.c.bf16 %v779_v53, %v778_v49  ;;  %v273_v56 = vpop.f32.mrb[11].mxu0  ;;  %v337_v57 = vpop.f32.mrb[11].mxu1 }
 0x109   :  { %v640_v58 = vpack.c.bf16 %v273_v56, %v270_v50  ;;  %v680_v59 = vpack.c.bf16 %v337_v57, %v334_v51 }
 0x10a   :  { %701 = vst [vmem:[%s961_s2 + $0x28] sm:$0xff] %v645_v54   ;;  %709 = vst [vmem:[%s961_s2 + $0x68] sm:$0xff] %v685_v55  }
 0x10b   :  { %700 = vst [vmem:[%s961_s2 + $0x20] sm:$0xff] %v640_v58   ;;  %708 = vst [vmem:[%s961_s2 + $0x60] sm:$0xff] %v680_v59  }
 0x10d   :  { %v766_v60 = vpop.f32.mrb[12].mxu0  ;;  %v782_v61 = vpop.f32.mrb[12].mxu1 }
 0x10e   :  { %v286_v62 = vpop.f32.mrb[13].mxu0  ;;  %v350_v63 = vpop.f32.mrb[13].mxu1 }
 0x10f   :  { %v767_v0 = vpop.f32.mrb[14].mxu0  ;;  %v783_v1 = vpop.f32.mrb[14].mxu1 }
 0x110   :  { %v655_v2 = vpack.c.bf16 %v767_v0, %v766_v60  ;;  %v695_v3 = vpack.c.bf16 %v783_v1, %v782_v61  ;;  %v289_v4 = vpop.f32.mrb[15].mxu0  ;;  %v353_v5 = vpop.f32.mrb[15].mxu1 }
 0x111   :  { %v650_v6 = vpack.c.bf16 %v289_v4, %v286_v62  ;;  %v690_v7 = vpack.c.bf16 %v353_v5, %v350_v63 }
 0x112   :  { %703 = vst [vmem:[%s961_s2 + $0x38] sm:$0xff] %v655_v2   ;;  %711 = vst [vmem:[%s961_s2 + $0x78] sm:$0xff] %v695_v3  }
 0x113   :  { %702 = vst [vmem:[%s961_s2 + $0x30] sm:$0xff] %v650_v6   ;;  %710 = vst [vmem:[%s961_s2 + $0x70] sm:$0xff] %v690_v7  }

// kernel: _gcn_forward_impl.5
= control target key start
LH: loop header
LB: loop body
LE: loop exit
PB: predicated region body
PF: predicated region fallthrough
CT: control target
= control target key end

     0   :  { %s1842_s0 = inlined_call_operand.vmem [shape: bf16[256,256], index: 0, kind: input, shape index: {}]   ;;  %s1843_s1 = inlined_call_operand.vmem [shape: bf16[256,128], index: 1, kind: input, shape index: {}]   ;;  %s1844_s2 = inlined_call_operand.vmem [shape: f32[1,128], index: 2, kind: input, shape index: {}]   ;;  %s1845_s3 = inlined_call_operand.hbm [shape: f32[256,128], index: 3, kind: output, shape index: {}]  }
   0x1   :  { %v1087_v0 = vld [vmem:[%s1843_s1 + $0x40] sm:$0xff]   ;;  %v1089_v2 = vld [vmem:[%s1843_s1 + $0x48] sm:$0xff]   ;;  %v1091_v4 = vld [vmem:[%s1843_s1 + $0x50] sm:$0xff]  }
   0x2   :  { %v1088_v1 = vld [vmem:[%s1843_s1] sm:$0xff]   ;;  %956 = vmatprep.subr.bf16.mxu0 %v1087_v0  ;;  %1068 = vmatprep.subr.bf16.mxu1 %v1087_v0  ;;  %v1090_v3 = vld [vmem:[%s1843_s1 + $0x8] sm:$0xff]   ;;  %v1092_v5 = vld [vmem:[%s1843_s1 + $0x10] sm:$0xff]  }
   0x3   :  { %957 = vmatpush3.bf16.msra.mxu0 %v1088_v1  ;;  %1076 = vmatpush3.bf16.msra.mxu1 %v1088_v1  ;;  %v1093_v6 = vld [vmem:[%s1843_s1 + $0x58] sm:$0xff]   ;;  %v1095_v8 = vld [vmem:[%s1843_s1 + $0x60] sm:$0xff]   ;;  %v1097_v10 = vld [vmem:[%s1843_s1 + $0x68] sm:$0xff]  }
   0x4   :  { %958 = vmatprep.subr.bf16.mxu0 %v1089_v2  ;;  %1069 = vmatprep.subr.bf16.mxu1 %v1089_v2  ;;  %v1094_v7 = vld [vmem:[%s1843_s1 + $0x18] sm:$0xff]   ;;  %v1096_v9 = vld [vmem:[%s1843_s1 + $0x20] sm:$0xff]   ;;  %v1098_v13 = vld [vmem:[%s1843_s1 + $0x28] sm:$0xff]  }
   0x5   :  { %v1105_v11 = vld [vmem:[%s1842_s0 + $0x4] ss:$8 sps:$4 sm:$0xff]   ;;  %v1099_v14 = vld [vmem:[%s1843_s1 + $0x70] sm:$0xff]   ;;  %v1101_v16 = vld [vmem:[%s1843_s1 + $0x78] sm:$0xff]  }
   0x6   :  { %v1108_v12 = vld [vmem:[%s1842_s0 + $0x84] ss:$8 sps:$4 sm:$0xff]   ;;  %375 = vmatprep.mubr.bf16.mxu0 %v1105_v11  ;;  %v1100_v15 = vld [vmem:[%s1843_s1 + $0x30] sm:$0xff]   ;;  %v1102_v17 = vld [vmem:[%s1843_s1 + $0x38] sm:$0xff]  }
   0x7   :  { %959 = vmatpush3.bf16.msra.mxu0 %v1090_v3  ;;  %1077 = vmatpush3.bf16.msra.mxu1 %v1090_v3  ;;  %v1103_v18 = vld [vmem:[%s1842_s0] ss:$8 sps:$4 sm:$0xff]   ;;  %v1109_v20 = vld [vmem:[%s1842_s0 + $0x14] ss:$8 sps:$4 sm:$0xff]  }
   0x8   :  { %960 = vmatprep.subr.bf16.mxu0 %v1091_v4  ;;  %1070 = vmatprep.subr.bf16.mxu1 %v1091_v4  ;;  %v1106_v19 = vld [vmem:[%s1842_s0 + $0x80] ss:$8 sps:$4 sm:$0xff]   ;;  %v1112_v21 = vld [vmem:[%s1842_s0 + $0x94] ss:$8 sps:$4 sm:$0xff]  }
   0x9   :  { %439 = vmatprep.mubr.bf16.mxu1 %v1108_v12 }
   0xb   :  { %961 = vmatpush3.bf16.msra.mxu0 %v1092_v5  ;;  %1078 = vmatpush3.bf16.msra.mxu1 %v1092_v5 }
   0xc   :  { %962 = vmatprep.subr.bf16.mxu0 %v1093_v6  ;;  %1071 = vmatprep.subr.bf16.mxu1 %v1093_v6 }
   0xf   :  { %963 = vmatpush3.bf16.msra.mxu0 %v1094_v7  ;;  %1079 = vmatpush3.bf16.msra.mxu1 %v1094_v7 }
  0x10   :  { %964 = vmatprep.subr.bf16.mxu0 %v1095_v8  ;;  %1072 = vmatprep.subr.bf16.mxu1 %v1095_v8 }
  0x13   :  { %965 = vmatpush3.bf16.msra.mxu0 %v1096_v9  ;;  %1080 = vmatpush3.bf16.msra.mxu1 %v1096_v9 }
  0x14   :  { %966 = vmatprep.subr.bf16.mxu0 %v1097_v10  ;;  %1073 = vmatprep.subr.bf16.mxu1 %v1097_v10 }
  0x17   :  { %967 = vmatpush3.bf16.msra.mxu0 %v1098_v13  ;;  %1081 = vmatpush3.bf16.msra.mxu1 %v1098_v13 }
  0x18   :  { %968 = vmatprep.subr.bf16.mxu0 %v1099_v14  ;;  %1074 = vmatprep.subr.bf16.mxu1 %v1099_v14 }
  0x1b   :  { %969 = vmatpush3.bf16.msra.mxu0 %v1100_v15  ;;  %1082 = vmatpush3.bf16.msra.mxu1 %v1100_v15 }
  0x1c   :  { %970 = vmatprep.subr.bf16.mxu0 %v1101_v16  ;;  %1075 = vmatprep.subr.bf16.mxu1 %v1101_v16 }
  0x1f   :  { %971 = vmatpush3.bf16.msra.mxu0 %v1102_v17  ;;  %1083 = vmatpush3.bf16.msra.mxu1 %v1102_v17 }
  0x22   :  { %376 = vmatmul.mubr.bf16.vlgmr.msra.gmra.mrb[0].mxu0 %v1103_v18  ;;  %440 = vmatmul.mubr.bf16.vlgmr.msra.gmra.mrb[0].mxu1 %v1106_v19 }
  0x23   :  { %383 = vmatprep.mubr.bf16.mxu0 %v1109_v20  ;;  %447 = vmatprep.mubr.bf16.mxu1 %v1112_v21 }
  0x24   :  { %8 = vsyncpa [#allocation3], 0  ;;  %v1111_v22 = vld [vmem:[%s1842_s0 + $0x10] ss:$8 sps:$4 sm:$0xff]   ;;  %v1115_v24 = vld [vmem:[%s1842_s0 + $0x24] ss:$8 sps:$4 sm:$0xff]   ;;  %v504_v48 = vlaneseq }
  0x25   :  { %v1114_v23 = vld [vmem:[%s1842_s0 + $0x90] ss:$8 sps:$4 sm:$0xff]   ;;  %v1118_v25 = vld [vmem:[%s1842_s0 + $0xa4] ss:$8 sps:$4 sm:$0xff]   ;;  %v1117_v26 = vld [vmem:[%s1842_s0 + $0x20] ss:$8 sps:$4 sm:$0xff]  }
  0x26   :  { %v1120_v27 = vld [vmem:[%s1842_s0 + $0xa0] ss:$8 sps:$4 sm:$0xff]   ;;  %v1121_v28 = vld [vmem:[%s1842_s0 + $0x34] ss:$8 sps:$4 sm:$0xff]   ;;  %v1123_v30 = vld [vmem:[%s1842_s0 + $0x30] ss:$8 sps:$4 sm:$0xff]  }
  0x27   :  { %v1124_v29 = vld [vmem:[%s1842_s0 + $0xb4] ss:$8 sps:$4 sm:$0xff]   ;;  %v1126_v31 = vld [vmem:[%s1842_s0 + $0xb0] ss:$8 sps:$4 sm:$0xff]   ;;  %v1127_v32 = vld [vmem:[%s1842_s0 + $0x44] ss:$8 sps:$4 sm:$0xff]  }
  0x28   :  { %v1130_v33 = vld [vmem:[%s1842_s0 + $0xc4] ss:$8 sps:$4 sm:$0xff]   ;;  %v1129_v34 = vld [vmem:[%s1842_s0 + $0x40] ss:$8 sps:$4 sm:$0xff]   ;;  %v1133_v36 = vld [vmem:[%s1842_s0 + $0x54] ss:$8 sps:$4 sm:$0xff]  }
  0x29   :  { %v1132_v35 = vld [vmem:[%s1842_s0 + $0xc0] ss:$8 sps:$4 sm:$0xff]   ;;  %v1136_v37 = vld [vmem:[%s1842_s0 + $0xd4] ss:$8 sps:$4 sm:$0xff]   ;;  %v1135_v38 = vld [vmem:[%s1842_s0 + $0x50] ss:$8 sps:$4 sm:$0xff]  }
  0x2a   :  { %384 = vmatmul.mubr.bf16.gmra.mrb[4].mxu0 %v1111_v22  ;;  %448 = vmatmul.mubr.bf16.gmra.mrb[4].mxu1 %v1114_v23  ;;  %v1138_v39 = vld [vmem:[%s1842_s0 + $0xd0] ss:$8 sps:$4 sm:$0xff]   ;;  %v1139_v40 = vld [vmem:[%s1842_s0 + $0x64] ss:$8 sps:$4 sm:$0xff]   ;;  %v1141_v42 = vld [vmem:[%s1842_s0 + $0x60] ss:$8 sps:$4 sm:$0xff]  }
  0x2b   :  { %391 = vmatprep.mubr.bf16.mxu0 %v1115_v24  ;;  %455 = vmatprep.mubr.bf16.mxu1 %v1118_v25  ;;  %v1142_v41 = vld [vmem:[%s1842_s0 + $0xe4] ss:$8 sps:$4 sm:$0xff]   ;;  %v1144_v43 = vld [vmem:[%s1842_s0 + $0xe0] ss:$8 sps:$4 sm:$0xff]   ;;  %v1145_v44 = vld [vmem:[%s1842_s0 + $0x74] ss:$8 sps:$4 sm:$0xff]  }
  0x2c   :  { %v1148_v45 = vld [vmem:[%s1842_s0 + $0xf4] ss:$8 sps:$4 sm:$0xff]   ;;  %v1147_v46 = vld [vmem:[%s1842_s0 + $0x70] ss:$8 sps:$4 sm:$0xff]   ;;  %v1470_v49 = vand.u32 127, %v504_v48 }
  0x2d   :  { %v1150_v47 = vld [vmem:[%s1842_s0 + $0xf0] ss:$8 sps:$4 sm:$0xff]   ;;  %v1475_v54 = vld [vmem:[%s1844_s2] ss:$0 sm:$0xff]  ;;  %s1303_s0 = smov [#allocation2]  }
  0x2e   :  { %vm506_vm0 = vcmp.lt.s32.totalorder %v1470_v49, 16  ;;  %s896_s2 = sshll.u32 %s1303_s0, 4  ;;  %s897_s2 = int_to_ptr.vmem [resolvable:$true] %s896_s2 }
  0x2f   :  { %s1279_s27 = scalar_lea.vmem %s897_s2, 4096  ;;  %p1284_p1 = scmp.lt.s32.totalorder %s897_s2, %s897_s2 }
  0x30   :  { %p1280_p0 = scmp.ne.s32.totalorder %s897_s2, %s1279_s27  ;;  %p1285_p2 = scmp.lt.s32.totalorder %s1279_s27, %s1279_s27 }
  0x32   :  { %392 = vmatmul.mubr.bf16.gmra.mrb[8].mxu0 %v1117_v26  ;;  %456 = vmatmul.mubr.bf16.gmra.mrb[8].mxu1 %v1120_v27  ;;  %p1286_p3 = por %p1285_p2, %p1284_p1 }
  0x33   :  { %399 = vmatprep.mubr.bf16.mxu0 %v1121_v28  ;;  %463 = vmatprep.mubr.bf16.mxu1 %v1124_v29 }
  0x34   :  { %p1287_p4 = pnand %p1286_p3, %p1280_p0 }
  0x3a   :  { %400 = vmatmul.mubr.bf16.gmra.mrb[12].mxu0 %v1123_v30  ;;  %464 = vmatmul.mubr.bf16.gmra.mrb[12].mxu1 %v1126_v31 }
  0x3b   :  { %407 = vmatprep.mubr.bf16.mxu0 %v1127_v32  ;;  %471 = vmatprep.mubr.bf16.mxu1 %v1130_v33 }
  0x42   :  { %408 = vmatmul.mubr.bf16.gmra.mrb[16].mxu0 %v1129_v34  ;;  %472 = vmatmul.mubr.bf16.gmra.mrb[16].mxu1 %v1132_v35 }
  0x43   :  { %415 = vmatprep.mubr.bf16.mxu0 %v1133_v36  ;;  %479 = vmatprep.mubr.bf16.mxu1 %v1136_v37 }
  0x4a   :  { %416 = vmatmul.mubr.bf16.gmra.mrb[20].mxu0 %v1135_v38  ;;  %480 = vmatmul.mubr.bf16.gmra.mrb[20].mxu1 %v1138_v39 }
  0x4b   :  { %423 = vmatprep.mubr.bf16.mxu0 %v1139_v40  ;;  %487 = vmatprep.mubr.bf16.mxu1 %v1142_v41 }
  0x52   :  { %424 = vmatmul.mubr.bf16.gmra.mrb[24].mxu0 %v1141_v42  ;;  %488 = vmatmul.mubr.bf16.gmra.mrb[24].mxu1 %v1144_v43 }
  0x53   :  { %431 = vmatprep.mubr.bf16.mxu0 %v1145_v44  ;;  %495 = vmatprep.mubr.bf16.mxu1 %v1148_v45 }
  0x5a   :  { %432 = vmatmul.mubr.bf16.gmra.mrb[28].mxu0 %v1147_v46  ;;  %496 = vmatmul.mubr.bf16.gmra.mrb[28].mxu1 %v1150_v47 }
  0xf5   :  { %v972_v50 = vpop.f32.mrb[0].mxu0  ;;  %v1020_v51 = vpop.f32.mrb[0].mxu1 }
  0xf6   :  { %v973_v52 = vpop.f32.mrb[1].mxu0  ;;  %v1021_v53 = vpop.f32.mrb[1].mxu1 }
  0xf7   :  { %v974_v55 = vadd.f32 %v973_v52, %v972_v50  ;;  %v1022_v56 = vadd.f32 %v1021_v53, %v1020_v51  ;;  %v975_v57 = vpop.f32.mrb[2].mxu0  ;;  %v1023_v58 = vpop.f32.mrb[2].mxu1 }
  0xf8   :  { %v976_v59 = vpop.f32.mrb[3].mxu0  ;;  %v1024_v60 = vpop.f32.mrb[3].mxu1 }
  0xf9   :  { %v977_v61 = vadd.f32 %v976_v59, %v975_v57  ;;  %v1025_v62 = vadd.f32 %v1024_v60, %v1023_v58  ;;  %v378_v63 = vadd.f32 %v974_v55, %v1475_v54  ;;  %v442_v0 = vadd.f32 %v1022_v56, %v1475_v54 }
  0xfb   :  { %v1482_v1 = vsel %vm506_vm0, %v378_v63, -1e+30  ;;  %v445_v2 = vadd.f32 %v1025_v62, %v1475_v54  ;;  %v1492_v5 = vsel %vm506_vm0, %v442_v0, -1e+30  ;;  %v381_v12 = vadd.f32 %v977_v61, %v1475_v54 }
  0xfc   :  { %539 = vmax.xlane.f32.xlu0 %v1482_v1 }
  0xfd   :  { %v978_v3 = vpop.f32.mrb[4].mxu0  ;;  %v1488_v4 = vsel %vm506_vm0, %v445_v2, -1e+30  ;;  %v1026_v6 = vpop.f32.mrb[4].mxu1  ;;  %v1505_v21 = vsel %vm506_vm0, %v381_v12, -1e+30 }
  0xfe   :  { %573 = vmax.xlane.f32.xlu1 %v1488_v4  ;;  %v979_v7 = vpop.f32.mrb[5].mxu0  ;;  %v1027_v8 = vpop.f32.mrb[5].mxu1 }
  0xff   :  { %v980_v9 = vadd.f32 %v979_v7, %v978_v3  ;;  %v981_v10 = vpop.f32.mrb[6].mxu0  ;;  %v1028_v11 = vadd.f32 %v1027_v8, %v1026_v6  ;;  %v1029_v13 = vpop.f32.mrb[6].mxu1 }
 0x100   :  { %571 = vmax.xlane.f32.xlu0 %v1492_v5  ;;  %v982_v14 = vpop.f32.mrb[7].mxu0  ;;  %v1030_v15 = vpop.f32.mrb[7].mxu1 }
 0x101   :  { %v983_v16 = vadd.f32 %v982_v14, %v981_v10  ;;  %v386_v17 = vadd.f32 %v980_v9, %v1475_v54  ;;  %v1031_v18 = vadd.f32 %v1030_v15, %v1029_v13  ;;  %v450_v19 = vadd.f32 %v1028_v11, %v1475_v54 }
 0x103   :  { %v1501_v20 = vsel %vm506_vm0, %v386_v17, -1e+30  ;;  %v389_v22 = vadd.f32 %v983_v16, %v1475_v54  ;;  %v453_v23 = vadd.f32 %v1031_v18, %v1475_v54  ;;  %v1517_v26 = vsel %vm506_vm0, %v450_v19, -1e+30 }
 0x104   :  { %543 = vmax.xlane.f32.xlu1 %v1501_v20  ;;  %541 = vmax.xlane.f32.xlu0 %v1505_v21 }
 0x105   :  { %v984_v24 = vpop.f32.mrb[8].mxu0  ;;  %v1513_v25 = vsel %vm506_vm0, %v389_v22, -1e+30  ;;  %v1032_v27 = vpop.f32.mrb[8].mxu1  ;;  %v1523_v35 = vsel %vm506_vm0, %v453_v23, -1e+30 }
 0x106   :  { %v985_v28 = vpop.f32.mrb[9].mxu0  ;;  %v1033_v29 = vpop.f32.mrb[9].mxu1 }
 0x107   :  { %v986_v30 = vadd.f32 %v985_v28, %v984_v24  ;;  %v987_v31 = vpop.f32.mrb[10].mxu0  ;;  %v1034_v32 = vadd.f32 %v1033_v29, %v1032_v27  ;;  %v1035_v33 = vpop.f32.mrb[10].mxu1 }
 0x108   :  { %545 = vmax.xlane.f32.xlu1 %v1513_v25  ;;  %575 = vmax.xlane.f32.xlu0 %v1517_v26  ;;  %v988_v34 = vpop.f32.mrb[11].mxu0  ;;  %v1036_v36 = vpop.f32.mrb[11].mxu1 }
 0x109   :  { %v989_v37 = vadd.f32 %v988_v34, %v987_v31  ;;  %v394_v38 = vadd.f32 %v986_v30, %v1475_v54  ;;  %v1037_v39 = vadd.f32 %v1036_v36, %v1035_v33  ;;  %v458_v40 = vadd.f32 %v1034_v32, %v1475_v54 }
 0x10b   :  { %v1529_v41 = vsel %vm506_vm0, %v394_v38, -1e+30  ;;  %v397_v42 = vadd.f32 %v989_v37, %v1475_v54  ;;  %v461_v43 = vadd.f32 %v1037_v39, %v1475_v54  ;;  %v1541_v46 = vsel %vm506_vm0, %v458_v40, -1e+30 }
 0x10c   :  { %577 = vmax.xlane.f32.xlu1 %v1523_v35  ;;  %547 = vmax.xlane.f32.xlu0 %v1529_v41 }
 0x10d   :  { %v990_v44 = vpop.f32.mrb[12].mxu0  ;;  %v1537_v45 = vsel %vm506_vm0, %v397_v42, -1e+30  ;;  %v1038_v47 = vpop.f32.mrb[12].mxu1  ;;  %v1547_v57 = vsel %vm506_vm0, %v461_v43, -1e+30 }
 0x10e   :  { %v991_v48 = vpop.f32.mrb[13].mxu0  ;;  %v1039_v50 = vpop.f32.mrb[13].mxu1 }
 0x10f   :  { %v992_v51 = vadd.f32 %v991_v48, %v990_v44  ;;  %v993_v52 = vpop.f32.mrb[14].mxu0  ;;  %v1040_v53 = vadd.f32 %v1039_v50, %v1038_v47  ;;  %v1041_v55 = vpop.f32.mrb[14].mxu1 }
 0x110   :  { %549 = vmax.xlane.f32.xlu1 %v1537_v45  ;;  %579 = vmax.xlane.f32.xlu0 %v1541_v46  ;;  %v994_v56 = vpop.f32.mrb[15].mxu0  ;;  %v1042_v58 = vpop.f32.mrb[15].mxu1 }
 0x111   :  { %v995_v59 = vadd.f32 %v994_v56, %v993_v52  ;;  %v402_v60 = vadd.f32 %v992_v51, %v1475_v54  ;;  %v1043_v61 = vadd.f32 %v1042_v58, %v1041_v55  ;;  %v466_v62 = vadd.f32 %v1040_v53, %v1475_v54 }
 0x113   :  { %v1553_v63 = vsel %vm506_vm0, %v402_v60, -1e+30  ;;  %v405_v0 = vadd.f32 %v995_v59, %v1475_v54  ;;  %v469_v2 = vadd.f32 %v1043_v61, %v1475_v54  ;;  %v1565_v7 = vsel %vm506_vm0, %v466_v62, -1e+30 }
 0x114   :  { %581 = vmax.xlane.f32.xlu1 %v1547_v57  ;;  %551 = vmax.xlane.f32.xlu0 %v1553_v63 }
 0x115   :  { %v996_v3 = vpop.f32.mrb[16].mxu0  ;;  %v1561_v6 = vsel %vm506_vm0, %v405_v0, -1e+30  ;;  %v1044_v8 = vpop.f32.mrb[16].mxu1  ;;  %v1571_v16 = vsel %vm506_vm0, %v469_v2, -1e+30 }
 0x116   :  { %v997_v9 = vpop.f32.mrb[17].mxu0  ;;  %v1045_v10 = vpop.f32.mrb[17].mxu1 }
 0x117   :  { %v998_v11 = vadd.f32 %v997_v9, %v996_v3  ;;  %v999_v12 = vpop.f32.mrb[18].mxu0  ;;  %v1046_v13 = vadd.f32 %v1045_v10, %v1044_v8  ;;  %v1047_v14 = vpop.f32.mrb[18].mxu1 }
 0x118   :  { %553 = vmax.xlane.f32.xlu1 %v1561_v6  ;;  %583 = vmax.xlane.f32.xlu0 %v1565_v7  ;;  %v1000_v15 = vpop.f32.mrb[19].mxu0  ;;  %v1048_v17 = vpop.f32.mrb[19].mxu1 }
 0x119   :  { %v1001_v18 = vadd.f32 %v1000_v15, %v999_v12  ;;  %v410_v19 = vadd.f32 %v998_v11, %v1475_v54  ;;  %v1049_v22 = vadd.f32 %v1048_v17, %v1047_v14  ;;  %v474_v23 = vadd.f32 %v1046_v13, %v1475_v54 }
 0x11b   :  { %v1577_v24 = vsel %vm506_vm0, %v410_v19, -1e+30  ;;  %v413_v27 = vadd.f32 %v1001_v18, %v1475_v54  ;;  %v477_v28 = vadd.f32 %v1049_v22, %v1475_v54  ;;  %v1589_v31 = vsel %vm506_vm0, %v474_v23, -1e+30 }
 0x11c   :  { %585 = vmax.xlane.f32.xlu1 %v1571_v16  ;;  %555 = vmax.xlane.f32.xlu0 %v1577_v24 }
 0x11d   :  { %v1002_v29 = vpop.f32.mrb[20].mxu0  ;;  %v1585_v30 = vsel %vm506_vm0, %v413_v27, -1e+30  ;;  %v1050_v32 = vpop.f32.mrb[20].mxu1  ;;  %v1595_v42 = vsel %vm506_vm0, %v477_v28, -1e+30 }
 0x11e   :  { %v1003_v33 = vpop.f32.mrb[21].mxu0  ;;  %v1051_v34 = vpop.f32.mrb[21].mxu1 }
 0x11f   :  { %v1004_v36 = vadd.f32 %v1003_v33, %v1002_v29  ;;  %v1005_v37 = vpop.f32.mrb[22].mxu0  ;;  %v1052_v38 = vadd.f32 %v1051_v34, %v1050_v32  ;;  %v1053_v39 = vpop.f32.mrb[22].mxu1 }
 0x120   :  { %557 = vmax.xlane.f32.xlu1 %v1585_v30  ;;  %587 = vmax.xlane.f32.xlu0 %v1589_v31  ;;  %v1006_v40 = vpop.f32.mrb[23].mxu0  ;;  %v1054_v43 = vpop.f32.mrb[23].mxu1 }
 0x121   :  { %v1007_v44 = vadd.f32 %v1006_v40, %v1005_v37  ;;  %v418_v47 = vadd.f32 %v1004_v36, %v1475_v54  ;;  %v1055_v48 = vadd.f32 %v1054_v43, %v1053_v39  ;;  %v482_v50 = vadd.f32 %v1052_v38, %v1475_v54 }
 0x123   :  { %v1601_v51 = vsel %vm506_vm0, %v418_v47, -1e+30  ;;  %v421_v52 = vadd.f32 %v1007_v44, %v1475_v54  ;;  %v485_v53 = vadd.f32 %v1055_v48, %v1475_v54  ;;  %v1613_v58 = vsel %vm506_vm0, %v482_v50, -1e+30 }
 0x124   :  { %589 = vmax.xlane.f32.xlu1 %v1595_v42  ;;  %559 = vmax.xlane.f32.xlu0 %v1601_v51 }
 0x125   :  { %v1008_v55 = vpop.f32.mrb[24].mxu0  ;;  %v1609_v56 = vsel %vm506_vm0, %v421_v52, -1e+30  ;;  %v1056_v59 = vpop.f32.mrb[24].mxu1  ;;  %v1619_v9 = vsel %vm506_vm0, %v485_v53, -1e+30 }
 0x126   :  { %v1009_v60 = vpop.f32.mrb[25].mxu0  ;;  %v1057_v61 = vpop.f32.mrb[25].mxu1 }
 0x127   :  { %v1010_v62 = vadd.f32 %v1009_v60, %v1008_v55  ;;  %v1011_v0 = vpop.f32.mrb[26].mxu0  ;;  %v1058_v2 = vadd.f32 %v1057_v61, %v1056_v59  ;;  %v1059_v3 = vpop.f32.mrb[26].mxu1 }
 0x128   :  { %561 = vmax.xlane.f32.xlu1 %v1609_v56  ;;  %591 = vmax.xlane.f32.xlu0 %v1613_v58  ;;  %v1012_v8 = vpop.f32.mrb[27].mxu0  ;;  %v1060_v10 = vpop.f32.mrb[27].mxu1 }
 0x129   :  { %v1013_v11 = vadd.f32 %v1012_v8, %v1011_v0  ;;  %v426_v12 = vadd.f32 %v1010_v62, %v1475_v54  ;;  %v1061_v13 = vadd.f32 %v1060_v10, %v1059_v3  ;;  %v490_v14 = vadd.f32 %v1058_v2, %v1475_v54 }
 0x12b   :  { %v1625_v15 = vsel %vm506_vm0, %v426_v12, -1e+30  ;;  %v429_v17 = vadd.f32 %v1013_v11, %v1475_v54  ;;  %v493_v18 = vadd.f32 %v1061_v13, %v1475_v54  ;;  %v1637_v23 = vsel %vm506_vm0, %v490_v14, -1e+30 }
 0x12c   :  { %593 = vmax.xlane.f32.xlu1 %v1619_v9  ;;  %563 = vmax.xlane.f32.xlu0 %v1625_v15 }
 0x12d   :  { %v1014_v19 = vpop.f32.mrb[28].mxu0  ;;  %v1633_v22 = vsel %vm506_vm0, %v429_v17, -1e+30  ;;  %v1062_v27 = vpop.f32.mrb[28].mxu1  ;;  %v1643_v38 = vsel %vm506_vm0, %v493_v18, -1e+30 }
 0x12e   :  { %v1015_v28 = vpop.f32.mrb[29].mxu0  ;;  %v1063_v29 = vpop.f32.mrb[29].mxu1 }
 0x12f   :  { %v1016_v32 = vadd.f32 %v1015_v28, %v1014_v19  ;;  %v1017_v33 = vpop.f32.mrb[30].mxu0  ;;  %v1064_v34 = vadd.f32 %v1063_v29, %v1062_v27  ;;  %v1065_v36 = vpop.f32.mrb[30].mxu1 }
 0x130   :  { %565 = vmax.xlane.f32.xlu1 %v1633_v22  ;;  %595 = vmax.xlane.f32.xlu0 %v1637_v23  ;;  %v1018_v37 = vpop.f32.mrb[31].mxu0  ;;  %v1066_v39 = vpop.f32.mrb[31].mxu1 }
 0x131   :  { %v1019_v40 = vadd.f32 %v1018_v37, %v1017_v33  ;;  %v434_v43 = vadd.f32 %v1016_v32, %v1475_v54  ;;  %v1067_v44 = vadd.f32 %v1066_v39, %v1065_v36  ;;  %v498_v47 = vadd.f32 %v1064_v34, %v1475_v54 }
 0x133   :  { %v1649_v48 = vsel %vm506_vm0, %v434_v43, -1e+30  ;;  %v437_v50 = vadd.f32 %v1019_v40, %v1475_v54  ;;  %v501_v52 = vadd.f32 %v1067_v44, %v1475_v54  ;;  %v1661_v55 = vsel %vm506_vm0, %v498_v47, -1e+30 }
 0x134   :  { %597 = vmax.xlane.f32.xlu1 %v1643_v38  ;;  %567 = vmax.xlane.f32.xlu0 %v1649_v48 }
 0x135   :  { %v1657_v53 = vsel %vm506_vm0, %v437_v50, -1e+30  ;;  %v1665_v59 = vsel %vm506_vm0, %v501_v52, -1e+30 }
 0x138   :  { %569 = vmax.xlane.f32.xlu1 %v1657_v53  ;;  %599 = vmax.xlane.f32.xlu0 %v1661_v55 }
 0x13c   :  { %601 = vmax.xlane.f32.xlu1 %v1665_v59 }
 0x189   :  { %v540_v54 = vpop.xlane.xlu0 %539 }
 0x18a   :  { %v1671_v60 = vsub.f32 %v1482_v1, %v540_v54 }
 0x18b   :  { %v574_v62 = vpop.xlane.xlu1 %573 }
 0x18c   :  { %v635_v61 = vmul.f32 1.442695, %v1671_v60  ;;  %v1679_v10 = vsub.f32 %v1488_v4, %v574_v62 }
 0x18d   :  { %v572_v0 = vpop.xlane.xlu0 %571 }
 0x18e   :  { %1151 = vpow2.f32 %v635_v61  ;;  %v1675_v2 = vsub.f32 %v1492_v5, %v572_v0  ;;  %v669_v17 = vmul.f32 1.442695, %v1679_v10 }
 0x190   :  { %v667_v49 = vmul.f32 1.442695, %v1675_v2 }
 0x191   :  { %v544_v3 = vpop.xlane.xlu1 %543  ;;  %v542_v8 = vpop.xlane.xlu0 %541 }
 0x192   :  { %1153 = vpow2.f32 %v667_v49  ;;  %v1682_v11 = vsub.f32 %v1501_v20, %v544_v3  ;;  %v1685_v1 = vsub.f32 %v1505_v21, %v542_v8 }
 0x194   :  { %v639_v12 = vmul.f32 1.442695, %v1682_v11  ;;  %v637_v13 = vmul.f32 1.442695, %v1685_v1 }
 0x195   :  { %v546_v5 = vpop.xlane.xlu1 %545  ;;  %v576_v14 = vpop.xlane.xlu0 %575 }
 0x196   :  { %1155 = vpow2.f32 %v639_v12  ;;  %v1691_v18 = vsub.f32 %v1513_v25, %v546_v5  ;;  %v1694_v4 = vsub.f32 %v1517_v26, %v576_v14 }
 0x197   :  { %1157 = vpow2.f32 %v637_v13 }
 0x198   :  { %v1152_v20 = vpop.eup %1151  ;;  %v671_v21 = vmul.f32 1.442695, %v1694_v4  ;;  %1159 = vpow2.f32 %v669_v17  ;;  %v641_v28 = vmul.f32 1.442695, %v1691_v18 }
 0x199   :  { %v578_v19 = vpop.xlane.xlu1 %577  ;;  %699 = vadd.xlane.f32.xlu0 %v1152_v20  ;;  %v548_v27 = vpop.xlane.xlu0 %547 }
 0x19a   :  { %v1699_v29 = vsub.f32 %v1523_v35, %v578_v19  ;;  %v1702_v32 = vsub.f32 %v1529_v41, %v548_v27  ;;  %1161 = vpow2.f32 %v671_v21 }
 0x19b   :  { %1163 = vpow2.f32 %v641_v28 }
 0x19c   :  { %v1154_v25 = vpop.eup %1153  ;;  %v643_v26 = vmul.f32 1.442695, %v1702_v32  ;;  %v673_v36 = vmul.f32 1.442695, %v1699_v29 }
 0x19d   :  { %v550_v33 = vpop.xlane.xlu1 %549  ;;  %731 = vadd.xlane.f32.xlu0 %v1154_v25  ;;  %v580_v34 = vpop.xlane.xlu0 %579 }
 0x19e   :  { %v1707_v37 = vsub.f32 %v1537_v45, %v550_v33  ;;  %v1710_v39 = vsub.f32 %v1541_v46, %v580_v34  ;;  %1165 = vpow2.f32 %v643_v26 }
 0x19f   :  { %1167 = vpow2.f32 %v673_v36 }
 0x1a0   :  { %v1156_v35 = vpop.eup %1155  ;;  %v675_v41 = vmul.f32 1.442695, %v1710_v39  ;;  %v645_v47 = vmul.f32 1.442695, %v1707_v37 }
 0x1a1   :  { %v1158_v40 = vpop.eup %1157  ;;  %v582_v43 = vpop.xlane.xlu1 %581  ;;  %703 = vadd.xlane.f32.xlu0 %v1156_v35 }
 0x1a2   :  { %v552_v44 = vpop.xlane.xlu0 %551  ;;  %v1715_v50 = vsub.f32 %v1547_v57, %v582_v43  ;;  %701 = vadd.xlane.f32.xlu1 %v1158_v40  ;;  %1169 = vpow2.f32 %v675_v41  ;;  %v1160_v46 = vpop.eup %1159 }
 0x1a3   :  { %v1718_v45 = vsub.f32 %v1553_v63, %v552_v44  ;;  %1171 = vpow2.f32 %v645_v47 }
 0x1a4   :  { %v1162_v54 = vpop.eup %1161  ;;  %v677_v0 = vmul.f32 1.442695, %v1715_v50 }
 0x1a5   :  { %v647_v52 = vmul.f32 1.442695, %v1718_v45  ;;  %v554_v61 = vpop.xlane.xlu1 %553  ;;  %735 = vadd.xlane.f32.xlu0 %v1162_v54  ;;  %v1164_v63 = vpop.eup %1163 }
 0x1a6   :  { %v584_v62 = vpop.xlane.xlu0 %583  ;;  %v1723_v49 = vsub.f32 %v1561_v6, %v554_v61  ;;  %733 = vadd.xlane.f32.xlu1 %v1160_v46 }
 0x1a7   :  { %v1726_v57 = vsub.f32 %v1565_v7, %v584_v62  ;;  %1173 = vpow2.f32 %v647_v52 }
 0x1a8   :  { %v1166_v8 = vpop.eup %1165  ;;  %1175 = vpow2.f32 %v677_v0  ;;  %v649_v5 = vmul.f32 1.442695, %v1723_v49 }
 0x1a9   :  { %v679_v3 = vmul.f32 1.442695, %v1726_v57  ;;  %v586_v12 = vpop.xlane.xlu1 %585  ;;  %707 = vadd.xlane.f32.xlu0 %v1166_v8  ;;  %v1168_v7 = vpop.eup %1167 }
 0x1aa   :  { %v556_v13 = vpop.xlane.xlu0 %555  ;;  %v1731_v14 = vsub.f32 %v1571_v16, %v586_v12  ;;  %705 = vadd.xlane.f32.xlu1 %v1164_v63 }
 0x1ab   :  { %v1734_v6 = vsub.f32 %v1577_v24, %v556_v13  ;;  %1177 = vpow2.f32 %v679_v3 }
 0x1ac   :  { %v1170_v20 = vpop.eup %1169  ;;  %1179 = vpow2.f32 %v649_v5  ;;  %v681_v27 = vmul.f32 1.442695, %v1731_v14 }
 0x1ad   :  { %v651_v17 = vmul.f32 1.442695, %v1734_v6  ;;  %v558_v21 = vpop.xlane.xlu1 %557  ;;  %739 = vadd.xlane.f32.xlu0 %v1170_v20  ;;  %v1172_v24 = vpop.eup %1171 }
 0x1ae   :  { %v588_v19 = vpop.xlane.xlu0 %587  ;;  %v1739_v28 = vsub.f32 %v1585_v30, %v558_v21  ;;  %737 = vadd.xlane.f32.xlu1 %v1168_v7 }
 0x1af   :  { %v1742_v16 = vsub.f32 %v1589_v31, %v588_v19  ;;  %1181 = vpow2.f32 %v651_v17 }
 0x1b0   :  { %1183 = vpow2.f32 %v681_v27  ;;  %v653_v36 = vmul.f32 1.442695, %v1739_v28 }
 0x1b1   :  { %v683_v25 = vmul.f32 1.442695, %v1742_v16  ;;  %v1174_v26 = vpop.eup %1173  ;;  %v590_v33 = vpop.xlane.xlu1 %589 }
 0x1b2   :  { %v560_v34 = vpop.xlane.xlu0 %559  ;;  %v1747_v35 = vsub.f32 %v1595_v42, %v590_v33  ;;  %709 = vadd.xlane.f32.xlu1 %v1172_v24  ;;  %711 = vadd.xlane.f32.xlu0 %v1174_v26  ;;  %v1176_v31 = vpop.eup %1175 }
 0x1b3   :  { %v1750_v30 = vsub.f32 %v1601_v51, %v560_v34  ;;  %1185 = vpow2.f32 %v683_v25 }
 0x1b4   :  { %1187 = vpow2.f32 %v653_v36  ;;  %v685_v47 = vmul.f32 1.442695, %v1747_v35 }
 0x1b5   :  { %v655_v41 = vmul.f32 1.442695, %v1750_v30  ;;  %v1178_v40 = vpop.eup %1177  ;;  %v562_v43 = vpop.xlane.xlu1 %561 }
 0x1b6   :  { %v592_v44 = vpop.xlane.xlu0 %591  ;;  %v1755_v46 = vsub.f32 %v1609_v56, %v562_v43  ;;  %741 = vadd.xlane.f32.xlu1 %v1176_v31  ;;  %743 = vadd.xlane.f32.xlu0 %v1178_v40  ;;  %v1180_v51 = vpop.eup %1179 }
 0x1b7   :  { %v1758_v42 = vsub.f32 %v1613_v58, %v592_v44  ;;  %1189 = vpow2.f32 %v655_v41 }
 0x1b8   :  { %1191 = vpow2.f32 %v685_v47  ;;  %v657_v0 = vmul.f32 1.442695, %v1755_v46 }
 0x1b9   :  { %v687_v52 = vmul.f32 1.442695, %v1758_v42  ;;  %v1182_v54 = vpop.eup %1181  ;;  %v594_v61 = vpop.xlane.xlu1 %593 }
 0x1ba   :  { %v564_v62 = vpop.xlane.xlu0 %563  ;;  %v1763_v63 = vsub.f32 %v1619_v9, %v594_v61  ;;  %713 = vadd.xlane.f32.xlu1 %v1180_v51  ;;  %715 = vadd.xlane.f32.xlu0 %v1182_v54  ;;  %v1184_v58 = vpop.eup %1183 }
 0x1bb   :  { %v1766_v56 = vsub.f32 %v1625_v15, %v564_v62  ;;  %1193 = vpow2.f32 %v687_v52 }
 0x1bc   :  { %1195 = vpow2.f32 %v657_v0  ;;  %v689_v5 = vmul.f32 1.442695, %v1763_v63 }
 0x1bd   :  { %v659_v3 = vmul.f32 1.442695, %v1766_v56  ;;  %v1186_v8 = vpop.eup %1185  ;;  %v566_v12 = vpop.xlane.xlu1 %565 }
 0x1be   :  { %v596_v13 = vpop.xlane.xlu0 %595  ;;  %v1771_v7 = vsub.f32 %v1633_v22, %v566_v12  ;;  %745 = vadd.xlane.f32.xlu1 %v1184_v58  ;;  %747 = vadd.xlane.f32.xlu0 %v1186_v8  ;;  %v1188_v15 = vpop.eup %1187 }
 0x1bf   :  { %v1774_v9 = vsub.f32 %v1637_v23, %v596_v13  ;;  %1197 = vpow2.f32 %v659_v3 }
 0x1c0   :  { %1199 = vpow2.f32 %v689_v5  ;;  %v661_v27 = vmul.f32 1.442695, %v1771_v7 }
 0x1c1   :  { %v691_v17 = vmul.f32 1.442695, %v1774_v9  ;;  %v1190_v20 = vpop.eup %1189  ;;  %v598_v21 = vpop.xlane.xlu1 %597 }
 0x1c2   :  { %v568_v19 = vpop.xlane.xlu0 %567  ;;  %v1779_v24 = vsub.f32 %v1643_v38, %v598_v21  ;;  %717 = vadd.xlane.f32.xlu1 %v1188_v15  ;;  %719 = vadd.xlane.f32.xlu0 %v1190_v20  ;;  %v1192_v23 = vpop.eup %1191 }
 0x1c3   :  { %v1782_v22 = vsub.f32 %v1649_v48, %v568_v19  ;;  %1201 = vpow2.f32 %v691_v17 }
 0x1c4   :  { %1203 = vpow2.f32 %v661_v27  ;;  %v693_v36 = vmul.f32 1.442695, %v1779_v24 }
 0x1c5   :  { %v663_v25 = vmul.f32 1.442695, %v1782_v22  ;;  %v1194_v26 = vpop.eup %1193  ;;  %v570_v33 = vpop.xlane.xlu1 %569 }
 0x1c6   :  { %v600_v34 = vpop.xlane.xlu0 %599  ;;  %749 = vadd.xlane.f32.xlu1 %v1192_v23  ;;  %751 = vadd.xlane.f32.xlu0 %v1194_v26  ;;  %v1790_v31 = vsub.f32 %v1657_v53, %v570_v33  ;;  %v1196_v48 = vpop.eup %1195 }
 0x1c7   :  { %v1787_v38 = vsub.f32 %v1661_v55, %v600_v34  ;;  %1205 = vpow2.f32 %v663_v25 }
 0x1c8   :  { %1207 = vpow2.f32 %v693_v36  ;;  %v665_v44 = vmul.f32 1.442695, %v1790_v31 }
 0x1c9   :  { %v695_v41 = vmul.f32 1.442695, %v1787_v38  ;;  %v1198_v40 = vpop.eup %1197  ;;  %v602_v43 = vpop.xlane.xlu1 %601 }
 0x1ca   :  { %721 = vadd.xlane.f32.xlu1 %v1196_v48  ;;  %723 = vadd.xlane.f32.xlu0 %v1198_v40  ;;  %v1795_v47 = vsub.f32 %v1665_v59, %v602_v43  ;;  %v1200_v55 = vpop.eup %1199 }
 0x1cb   :  { %1209 = vpow2.f32 %v695_v41 }
 0x1cc   :  { %1211 = vpow2.f32 %v665_v44  ;;  %v697_v53 = vmul.f32 1.442695, %v1795_v47 }
 0x1cd   :  { %v1202_v51 = vpop.eup %1201 }
 0x1ce   :  { %753 = vadd.xlane.f32.xlu1 %v1200_v55  ;;  %755 = vadd.xlane.f32.xlu0 %v1202_v51  ;;  %v1204_v52 = vpop.eup %1203  ;;  %1213 = vpow2.f32 %v697_v53 }
 0x1d1   :  { %v1206_v54 = vpop.eup %1205 }
 0x1d2   :  { %725 = vadd.xlane.f32.xlu1 %v1204_v52  ;;  %727 = vadd.xlane.f32.xlu0 %v1206_v54  ;;  %v1208_v61 = vpop.eup %1207 }
 0x1d5   :  { %v1210_v62 = vpop.eup %1209 }
 0x1d6   :  { %757 = vadd.xlane.f32.xlu1 %v1208_v61  ;;  %759 = vadd.xlane.f32.xlu0 %v1210_v62  ;;  %v1212_v0 = vpop.eup %1211 }
 0x1d8   :  { %v1214_v59 = vpop.eup %1213 }
 0x1da   :  { %729 = vadd.xlane.f32.xlu1 %v1212_v0 }
 0x1de   :  { %761 = vadd.xlane.f32.xlu1 %v1214_v59 }
 0x226   :  { %v700_v58 = vpop.xlane.xlu0 %699 }
 0x227   :  { %1215 = vlog2.f32 %v700_v58 }
 0x22a   :  { %v732_v3 = vpop.xlane.xlu0 %731 }
 0x22b   :  { %1217 = vlog2.f32 %v732_v3 }
 0x22e   :  { %v704_v8 = vpop.xlane.xlu0 %703 }
 0x22f   :  { %v702_v12 = vpop.xlane.xlu1 %701  ;;  %1219 = vlog2.f32 %v704_v8 }
 0x230   :  { %1221 = vlog2.f32 %v702_v12 }
 0x231   :  { %v1216_v13 = vpop.eup %1215 }
 0x232   :  { %v764_v5 = vmul.f32 0.6931472, %v1216_v13  ;;  %v736_v17 = vpop.xlane.xlu0 %735 }
 0x233   :  { %v734_v15 = vpop.xlane.xlu1 %733 }
 0x234   :  { %v827_v20 = vsub.f32 %v1671_v60, %v764_v5  ;;  %1223 = vlog2.f32 %v734_v15 }
 0x235   :  { %v1218_v21 = vpop.eup %1217  ;;  %1225 = vlog2.f32 %v736_v17 }
 0x236   :  { %859 = vst [vmem:[#allocation2] sm:$0xff] %v827_v20  ;;  %v796_v19 = vmul.f32 0.6931472, %v1218_v21  ;;  %v708_v23 = vpop.xlane.xlu0 %707 }
 0x237   :  { %v706_v27 = vpop.xlane.xlu1 %705 }
 0x238   :  { %v843_v25 = vsub.f32 %v1675_v2, %v796_v19  ;;  %1227 = vlog2.f32 %v706_v27 }
 0x239   :  { %v1220_v26 = vpop.eup %1219  ;;  %1229 = vlog2.f32 %v708_v23 }
 0x23a   :  { %v1222_v33 = vpop.eup %1221  ;;  %875 = vst [vmem:[#allocation2 + $0x80] sm:$0xff] %v843_v25  ;;  %v768_v34 = vmul.f32 0.6931472, %v1220_v26  ;;  %v740_v41 = vpop.xlane.xlu0 %739 }
 0x23b   :  { %v766_v36 = vmul.f32 0.6931472, %v1222_v33  ;;  %v738_v48 = vpop.xlane.xlu1 %737 }
 0x23c   :  { %v829_v60 = vsub.f32 %v1682_v11, %v768_v34  ;;  %1231 = vlog2.f32 %v738_v48 }
 0x23d   :  { %v828_v40 = vsub.f32 %v1685_v1, %v766_v36  ;;  %1233 = vlog2.f32 %v740_v41 }
 0x23e   :  { %v1224_v43 = vpop.eup %1223  ;;  %861 = vst [vmem:[#allocation2 + $0x10] sm:$0xff] %v829_v60 }
 0x23f   :  { %v1226_v44 = vpop.eup %1225  ;;  %860 = vst [vmem:[#allocation2 + $0x8] sm:$0xff] %v828_v40  ;;  %v798_v2 = vmul.f32 0.6931472, %v1224_v43  ;;  %v710_v55 = vpop.xlane.xlu1 %709 }
 0x240   :  { %v712_v51 = vpop.xlane.xlu0 %711  ;;  %v800_v53 = vmul.f32 0.6931472, %v1226_v44  ;;  %1235 = vlog2.f32 %v710_v55 }
 0x241   :  { %v844_v52 = vsub.f32 %v1679_v10, %v798_v2  ;;  %1237 = vlog2.f32 %v712_v51 }
 0x242   :  { %v1228_v54 = vpop.eup %1227  ;;  %v845_v61 = vsub.f32 %v1694_v4, %v800_v53 }
 0x243   :  { %v1230_v11 = vpop.eup %1229  ;;  %876 = vst [vmem:[#allocation2 + $0x88] sm:$0xff] %v844_v52  ;;  %v770_v62 = vmul.f32 0.6931472, %v1228_v54  ;;  %v742_v1 = vpop.xlane.xlu1 %741 }
 0x244   :  { %v744_v0 = vpop.xlane.xlu0 %743  ;;  %877 = vst [vmem:[#allocation2 + $0x90] sm:$0xff] %v845_v61  ;;  %v772_v59 = vmul.f32 0.6931472, %v1230_v11  ;;  %1239 = vlog2.f32 %v742_v1 }
 0x245   :  { %v830_v58 = vsub.f32 %v1691_v18, %v770_v62  ;;  %1241 = vlog2.f32 %v744_v0 }
 0x246   :  { %v1232_v3 = vpop.eup %1231  ;;  %v831_v8 = vsub.f32 %v1702_v32, %v772_v59 }
 0x247   :  { %v1234_v12 = vpop.eup %1233  ;;  %862 = vst [vmem:[#allocation2 + $0x18] sm:$0xff] %v830_v58  ;;  %v802_v10 = vmul.f32 0.6931472, %v1232_v3  ;;  %v714_v13 = vpop.xlane.xlu1 %713 }
 0x248   :  { %v716_v5 = vpop.xlane.xlu0 %715  ;;  %863 = vst [vmem:[#allocation2 + $0x20] sm:$0xff] %v831_v8  ;;  %v804_v4 = vmul.f32 0.6931472, %v1234_v12  ;;  %1243 = vlog2.f32 %v714_v13 }
 0x249   :  { %v846_v15 = vsub.f32 %v1699_v29, %v802_v10  ;;  %1245 = vlog2.f32 %v716_v5 }
 0x24a   :  { %v1236_v17 = vpop.eup %1235  ;;  %v847_v20 = vsub.f32 %v1710_v39, %v804_v4 }
 0x24b   :  { %v1238_v21 = vpop.eup %1237  ;;  %878 = vst [vmem:[#allocation2 + $0x98] sm:$0xff] %v846_v15  ;;  %v774_v18 = vmul.f32 0.6931472, %v1236_v17  ;;  %v746_v19 = vpop.xlane.xlu1 %745 }
 0x24c   :  { %v748_v27 = vpop.xlane.xlu0 %747  ;;  %879 = vst [vmem:[#allocation2 + $0xa0] sm:$0xff] %v847_v20  ;;  %v776_v32 = vmul.f32 0.6931472, %v1238_v21  ;;  %1247 = vlog2.f32 %v746_v19 }
 0x24d   :  { %v832_v23 = vsub.f32 %v1707_v37, %v774_v18  ;;  %1249 = vlog2.f32 %v748_v27 }
 0x24e   :  { %v1240_v25 = vpop.eup %1239  ;;  %v833_v26 = vsub.f32 %v1718_v45, %v776_v32 }
 0x24f   :  { %v1242_v33 = vpop.eup %1241  ;;  %864 = vst [vmem:[#allocation2 + $0x28] sm:$0xff] %v832_v23  ;;  %v806_v29 = vmul.f32 0.6931472, %v1240_v25  ;;  %v718_v34 = vpop.xlane.xlu1 %717 }
 0x250   :  { %v720_v36 = vpop.xlane.xlu0 %719  ;;  %865 = vst [vmem:[#allocation2 + $0x30] sm:$0xff] %v833_v26  ;;  %v808_v39 = vmul.f32 0.6931472, %v1242_v33  ;;  %1251 = vlog2.f32 %v718_v34 }
 0x251   :  { %v848_v48 = vsub.f32 %v1715_v50, %v806_v29  ;;  %1253 = vlog2.f32 %v720_v36 }
 0x252   :  { %v1244_v41 = vpop.eup %1243  ;;  %v849_v60 = vsub.f32 %v1726_v57, %v808_v39 }
 0x253   :  { %v1246_v40 = vpop.eup %1245  ;;  %880 = vst [vmem:[#allocation2 + $0xa8] sm:$0xff] %v848_v48  ;;  %v778_v37 = vmul.f32 0.6931472, %v1244_v41  ;;  %v750_v43 = vpop.xlane.xlu1 %749 }
 0x254   :  { %v752_v44 = vpop.xlane.xlu0 %751  ;;  %881 = vst [vmem:[#allocation2 + $0xb0] sm:$0xff] %v849_v60  ;;  %v780_v45 = vmul.f32 0.6931472, %v1246_v40  ;;  %1255 = vlog2.f32 %v750_v43 }
 0x255   :  { %v834_v2 = vsub.f32 %v1723_v49, %v778_v37  ;;  %1257 = vlog2.f32 %v752_v44 }
 0x256   :  { %v1248_v55 = vpop.eup %1247  ;;  %v835_v51 = vsub.f32 %v1734_v6, %v780_v45 }
 0x257   :  { %v1250_v53 = vpop.eup %1249  ;;  %866 = vst [vmem:[#allocation2 + $0x38] sm:$0xff] %v834_v2  ;;  %v810_v50 = vmul.f32 0.6931472, %v1248_v55  ;;  %v722_v52 = vpop.xlane.xlu1 %721 }
 0x258   :  { %v724_v54 = vpop.xlane.xlu0 %723  ;;  %867 = vst [vmem:[#allocation2 + $0x40] sm:$0xff] %v835_v51  ;;  %v812_v57 = vmul.f32 0.6931472, %v1250_v53  ;;  %1259 = vlog2.f32 %v722_v52 }
 0x259   :  { %v850_v61 = vsub.f32 %v1731_v14, %v810_v50  ;;  %1261 = vlog2.f32 %v724_v54 }
 0x25a   :  { %v1252_v11 = vpop.eup %1251  ;;  %v851_v62 = vsub.f32 %v1742_v16, %v812_v57 }
 0x25b   :  { %v1254_v1 = vpop.eup %1253  ;;  %882 = vst [vmem:[#allocation2 + $0xb8] sm:$0xff] %v850_v61  ;;  %v782_v49 = vmul.f32 0.6931472, %v1252_v11  ;;  %v754_v0 = vpop.xlane.xlu1 %753 }
 0x25c   :  { %v756_v59 = vpop.xlane.xlu0 %755  ;;  %883 = vst [vmem:[#allocation2 + $0xc0] sm:$0xff] %v851_v62  ;;  %v784_v6 = vmul.f32 0.6931472, %v1254_v1  ;;  %1263 = vlog2.f32 %v754_v0 }
 0x25d   :  { %v836_v58 = vsub.f32 %v1739_v28, %v782_v49  ;;  %1265 = vlog2.f32 %v756_v59 }
 0x25e   :  { %v1256_v3 = vpop.eup %1255  ;;  %v837_v8 = vsub.f32 %v1750_v30, %v784_v6 }
 0x25f   :  { %v1258_v12 = vpop.eup %1257  ;;  %868 = vst [vmem:[#allocation2 + $0x48] sm:$0xff] %v836_v58  ;;  %v814_v14 = vmul.f32 0.6931472, %v1256_v3  ;;  %v726_v10 = vpop.xlane.xlu1 %725 }
 0x260   :  { %v728_v13 = vpop.xlane.xlu0 %727  ;;  %869 = vst [vmem:[#allocation2 + $0x50] sm:$0xff] %v837_v8  ;;  %v816_v16 = vmul.f32 0.6931472, %v1258_v12  ;;  %1267 = vlog2.f32 %v726_v10 }
 0x261   :  { %v852_v5 = vsub.f32 %v1747_v35, %v814_v14  ;;  %1269 = vlog2.f32 %v728_v13 }
 0x262   :  { %v1260_v4 = vpop.eup %1259  ;;  %v853_v15 = vsub.f32 %v1758_v42, %v816_v16 }
 0x263   :  { %v1262_v17 = vpop.eup %1261  ;;  %884 = vst [vmem:[#allocation2 + $0xc8] sm:$0xff] %v852_v5  ;;  %v786_v28 = vmul.f32 0.6931472, %v1260_v4  ;;  %v758_v20 = vpop.xlane.xlu1 %757 }
 0x264   :  { %v760_v21 = vpop.xlane.xlu0 %759  ;;  %885 = vst [vmem:[#allocation2 + $0xd0] sm:$0xff] %v853_v15  ;;  %v788_v30 = vmul.f32 0.6931472, %v1262_v17  ;;  %1271 = vlog2.f32 %v758_v20 }
 0x265   :  { %v838_v18 = vsub.f32 %v1755_v46, %v786_v28  ;;  %1273 = vlog2.f32 %v760_v21 }
 0x266   :  { %v1264_v19 = vpop.eup %1263  ;;  %v839_v27 = vsub.f32 %v1766_v56, %v788_v30 }
 0x267   :  { %v1266_v32 = vpop.eup %1265  ;;  %870 = vst [vmem:[#allocation2 + $0x58] sm:$0xff] %v838_v18  ;;  %v818_v35 = vmul.f32 0.6931472, %v1264_v19  ;;  %v730_v23 = vpop.xlane.xlu1 %729 }
 0x268   :  { %871 = vst [vmem:[#allocation2 + $0x60] sm:$0xff] %v839_v27  ;;  %v820_v42 = vmul.f32 0.6931472, %v1266_v32  ;;  %1275 = vlog2.f32 %v730_v23 }
 0x269   :  { %v854_v25 = vsub.f32 %v1763_v63, %v818_v35 }
 0x26a   :  { %v1268_v26 = vpop.eup %1267  ;;  %v855_v33 = vsub.f32 %v1774_v9, %v820_v42 }
 0x26b   :  { %v1270_v29 = vpop.eup %1269  ;;  %886 = vst [vmem:[#allocation2 + $0xd8] sm:$0xff] %v854_v25  ;;  %v790_v34 = vmul.f32 0.6931472, %v1268_v26  ;;  %v762_v46 = vpop.xlane.xlu1 %761 }
 0x26c   :  { %887 = vst [vmem:[#allocation2 + $0xe0] sm:$0xff] %v855_v33  ;;  %v792_v36 = vmul.f32 0.6931472, %v1270_v29  ;;  %1277 = vlog2.f32 %v762_v46 }
 0x26d   :  { %v840_v56 = vsub.f32 %v1771_v7, %v790_v34 }
 0x26e   :  { %v1272_v39 = vpop.eup %1271  ;;  %v841_v48 = vsub.f32 %v1782_v22, %v792_v36 }
 0x26f   :  { %v1274_v41 = vpop.eup %1273  ;;  %872 = vst [vmem:[#allocation2 + $0x68] sm:$0xff] %v840_v56  ;;  %v822_v60 = vmul.f32 0.6931472, %v1272_v39 }
 0x270   :  { %873 = vst [vmem:[#allocation2 + $0x70] sm:$0xff] %v841_v48  ;;  %v824_v63 = vmul.f32 0.6931472, %v1274_v41 }
 0x271   :  { %v856_v40 = vsub.f32 %v1779_v24, %v822_v60 }
 0x272   :  { %v1276_v9 = vpop.eup %1275  ;;  %v857_v37 = vsub.f32 %v1787_v38, %v824_v63 }
 0x273   :  { %888 = vst [vmem:[#allocation2 + $0xe8] sm:$0xff] %v856_v40  ;;  %v794_v43 = vmul.f32 0.6931472, %v1276_v9 }
 0x274   :  { %889 = vst [vmem:[#allocation2 + $0xf0] sm:$0xff] %v857_v37 }
 0x275   :  { %v842_v44 = vsub.f32 %v1790_v31, %v794_v43 }
 0x276   :  { %v1278_v45 = vpop.eup %1277 }
 0x277   :  { %874 = vst [vmem:[#allocation2 + $0x78] sm:$0xff] %v842_v44  ;;  %v826_v7 = vmul.f32 0.6931472, %v1278_v45 }
 0x279   :  { %v858_v22 = vsub.f32 %v1795_v47, %v826_v7 }
 0x27b   :  { %890 = vst [vmem:[#allocation2 + $0xf8] sm:$0xff] %v858_v22 }
 0x27c   :  { %1290 = shalt.err (!%p1287_p4)
}
 0x27d   :  { %s1291_s29 = scalar_lea.hbm %s1845_s3, 4096 }
 0x27e   :  { %p1292_p5 = scmp.ne.s32.totalorder %s1845_s3, %s1291_s29  ;;  %p1295_p6 = scmp.lt.u32.totalorder %s1291_s29, %s1845_s3 }
 0x280   :  { %p1297_p7 = pnand %p1295_p6, %p1292_p5 }
 0x282   :  { %1300 = shalt.err (!%p1297_p7)
}
 0x283   :  { %s1304_s7 = smov 128   ;;  %s1305_s8 = smov 8  }
 0x284   :  { %902 = dma.vmem_to_hbm [thread:$0]  %s897_s2, 4096, %s1845_s3, [#allocation3], %s1304_s7, %s1304_s7, %s1305_s8  }
 0x285   :  { %1301 = dma.done.wait [#allocation3], 4096  }
 0x286   :  { %1302 = vsyncadd [#allocation3], 4294963200 }
 0x287   :  { %906 = vsyncpa [#allocation3], 1 }

// kernel: _gcn_forward_impl.4
= control target key start
LH: loop header
LB: loop body
LE: loop exit
PB: predicated region body
PF: predicated region fallthrough
CT: control target
= control target key end

     0   :  { %s1721_s1 = inlined_call_operand.vmem [shape: bf16[256,128], index: 1, kind: input, shape index: {}]   ;;  %s1722_s0 = inlined_call_operand.vmem [shape: bf16[256,256], index: 0, kind: input, shape index: {}]   ;;  %s1723_s3 = inlined_call_operand.vmem [shape: bf16[128,128], index: 3, kind: input, shape index: {}]   ;;  %s1724_s2 = inlined_call_operand.vmem [shape: f32[1,128], index: 2, kind: input, shape index: {}]   ;;  %s1725_s4 = inlined_call_operand.vmem [shape: bf16[256,128], index: 4, kind: output, shape index: {}]  }
   0x1   :  { %v1359_v0 = vld [vmem:[%s1721_s1 + $0x40] sm:$0xff]   ;;  %v1361_v2 = vld [vmem:[%s1721_s1 + $0x48] sm:$0xff]   ;;  %v1363_v4 = vld [vmem:[%s1721_s1 + $0x50] sm:$0xff]  }
   0x2   :  { %v1360_v1 = vld [vmem:[%s1721_s1] sm:$0xff]   ;;  %1159 = vmatprep.subr.bf16.mxu0 %v1359_v0  ;;  %1343 = vmatprep.subr.bf16.mxu1 %v1359_v0  ;;  %v1362_v3 = vld [vmem:[%s1721_s1 + $0x8] sm:$0xff]   ;;  %v1364_v5 = vld [vmem:[%s1721_s1 + $0x10] sm:$0xff]  }
   0x3   :  { %1160 = vmatpush3.bf16.msra.mxu0 %v1360_v1  ;;  %1351 = vmatpush3.bf16.msra.mxu1 %v1360_v1  ;;  %v1365_v6 = vld [vmem:[%s1721_s1 + $0x58] sm:$0xff]   ;;  %v1367_v8 = vld [vmem:[%s1721_s1 + $0x60] sm:$0xff]   ;;  %v1369_v10 = vld [vmem:[%s1721_s1 + $0x68] sm:$0xff]  }
   0x4   :  { %1161 = vmatprep.subr.bf16.mxu0 %v1361_v2  ;;  %1344 = vmatprep.subr.bf16.mxu1 %v1361_v2  ;;  %v1366_v7 = vld [vmem:[%s1721_s1 + $0x18] sm:$0xff]   ;;  %v1368_v9 = vld [vmem:[%s1721_s1 + $0x20] sm:$0xff]   ;;  %v1370_v12 = vld [vmem:[%s1721_s1 + $0x28] sm:$0xff]  }
   0x5   :  { %v1377_v11 = vld [vmem:[%s1722_s0 + $0x4] ss:$8 sps:$4 sm:$0xff]   ;;  %v1371_v13 = vld [vmem:[%s1721_s1 + $0x70] sm:$0xff]   ;;  %v1373_v15 = vld [vmem:[%s1721_s1 + $0x78] sm:$0xff]  }
   0x6   :  { %377 = vmatprep.mubr.bf16.mxu0 %v1377_v11  ;;  %v1372_v14 = vld [vmem:[%s1721_s1 + $0x30] sm:$0xff]   ;;  %v1374_v16 = vld [vmem:[%s1721_s1 + $0x38] sm:$0xff]   ;;  %v1375_v17 = vld [vmem:[%s1722_s0] ss:$8 sps:$4 sm:$0xff]  }
   0x7   :  { %1162 = vmatpush3.bf16.msra.mxu0 %v1362_v3  ;;  %1352 = vmatpush3.bf16.msra.mxu1 %v1362_v3  ;;  %v1407_v18 = vld [vmem:[%s1722_s0 + $0xc4] ss:$8 sps:$4 sm:$0xff]   ;;  %v1378_v19 = vld [vmem:[%s1722_s0 + $0x14] ss:$8 sps:$4 sm:$0xff]   ;;  %v1405_v20 = vld [vmem:[%s1722_s0 + $0xc0] ss:$8 sps:$4 sm:$0xff]  }
   0x8   :  { %1163 = vmatprep.subr.bf16.mxu0 %v1363_v4  ;;  %1345 = vmatprep.subr.bf16.mxu1 %v1363_v4  ;;  %v1411_v21 = vld [vmem:[%s1722_s0 + $0xd4] ss:$8 sps:$4 sm:$0xff]   ;;  %v1380_v22 = vld [vmem:[%s1722_s0 + $0x10] ss:$8 sps:$4 sm:$0xff]   ;;  %v1381_v23 = vld [vmem:[%s1722_s0 + $0x24] ss:$8 sps:$4 sm:$0xff]  }
   0x9   :  { %473 = vmatprep.mubr.bf16.mxu1 %v1407_v18  ;;  %v1413_v24 = vld [vmem:[%s1722_s0 + $0xd0] ss:$8 sps:$4 sm:$0xff]   ;;  %v1417_v25 = vld [vmem:[%s1722_s0 + $0xe4] ss:$8 sps:$4 sm:$0xff]   ;;  %v1383_v29 = vld [vmem:[%s1722_s0 + $0x20] ss:$8 sps:$4 sm:$0xff]  }
   0xa   :  { %v1423_v26 = vld [vmem:[%s1723_s3] sm:$0xff]   ;;  %v1424_v27 = vld [vmem:[%s1723_s3 + $0x8] sm:$0xff]   ;;  %v1425_v28 = vld [vmem:[%s1723_s3 + $0x10] sm:$0xff]  }
   0xb   :  { %1164 = vmatpush3.bf16.msra.mxu0 %v1364_v5  ;;  %1353 = vmatpush3.bf16.msra.mxu1 %v1364_v5  ;;  %v1384_v30 = vld [vmem:[%s1722_s0 + $0x34] ss:$8 sps:$4 sm:$0xff]   ;;  %v1419_v31 = vld [vmem:[%s1722_s0 + $0xe0] ss:$8 sps:$4 sm:$0xff]   ;;  %v1386_v33 = vld [vmem:[%s1722_s0 + $0x30] ss:$8 sps:$4 sm:$0xff]  }
   0xc   :  { %1165 = vmatprep.subr.bf16.mxu0 %v1365_v6  ;;  %1346 = vmatprep.subr.bf16.mxu1 %v1365_v6  ;;  %v1420_v32 = vld [vmem:[%s1722_s0 + $0xf4] ss:$8 sps:$4 sm:$0xff]   ;;  %v1387_v34 = vld [vmem:[%s1722_s0 + $0x44] ss:$8 sps:$4 sm:$0xff]   ;;  %v1422_v35 = vld [vmem:[%s1722_s0 + $0xf0] ss:$8 sps:$4 sm:$0xff]  }
   0xd   :  { %v1389_v36 = vld [vmem:[%s1722_s0 + $0x40] ss:$8 sps:$4 sm:$0xff]   ;;  %v1390_v37 = vld [vmem:[%s1722_s0 + $0x54] ss:$8 sps:$4 sm:$0xff]   ;;  %v1392_v38 = vld [vmem:[%s1722_s0 + $0x50] ss:$8 sps:$4 sm:$0xff]  }
   0xe   :  { %v1393_v39 = vld [vmem:[%s1722_s0 + $0x64] ss:$8 sps:$4 sm:$0xff]   ;;  %v1395_v40 = vld [vmem:[%s1722_s0 + $0x60] ss:$8 sps:$4 sm:$0xff]   ;;  %v1396_v41 = vld [vmem:[%s1722_s0 + $0x74] ss:$8 sps:$4 sm:$0xff]  }
   0xf   :  { %1166 = vmatpush3.bf16.msra.mxu0 %v1366_v7  ;;  %1354 = vmatpush3.bf16.msra.mxu1 %v1366_v7  ;;  %v1398_v42 = vld [vmem:[%s1722_s0 + $0x70] ss:$8 sps:$4 sm:$0xff]   ;;  %v1399_v43 = vld [vmem:[%s1722_s0 + $0x84] ss:$8 sps:$4 sm:$0xff]   ;;  %v1401_v44 = vld [vmem:[%s1722_s0 + $0x80] ss:$8 sps:$4 sm:$0xff]  }
  0x10   :  { %1167 = vmatprep.subr.bf16.mxu0 %v1367_v8  ;;  %1347 = vmatprep.subr.bf16.mxu1 %v1367_v8  ;;  %v1402_v45 = vld [vmem:[%s1722_s0 + $0x94] ss:$8 sps:$4 sm:$0xff]   ;;  %v1404_v46 = vld [vmem:[%s1722_s0 + $0x90] ss:$8 sps:$4 sm:$0xff]   ;;  %v1408_v47 = vld [vmem:[%s1722_s0 + $0xa4] ss:$8 sps:$4 sm:$0xff]  }
  0x11   :  { %v1410_v48 = vld [vmem:[%s1722_s0 + $0xa0] ss:$8 sps:$4 sm:$0xff]   ;;  %v1414_v49 = vld [vmem:[%s1722_s0 + $0xb4] ss:$8 sps:$4 sm:$0xff]   ;;  %v1416_v51 = vld [vmem:[%s1722_s0 + $0xb0] ss:$8 sps:$4 sm:$0xff]  }
  0x12   :  { %v1426_v50 = vld [vmem:[%s1723_s3 + $0x18] sm:$0xff]   ;;  %v1427_v52 = vld [vmem:[%s1723_s3 + $0x20] sm:$0xff]   ;;  %v1428_v53 = vld [vmem:[%s1723_s3 + $0x28] sm:$0xff]  }
  0x13   :  { %1168 = vmatpush3.bf16.msra.mxu0 %v1368_v9  ;;  %1355 = vmatpush3.bf16.msra.mxu1 %v1368_v9  ;;  %v1429_v54 = vld [vmem:[%s1723_s3 + $0x30] sm:$0xff]   ;;  %v1430_v55 = vld [vmem:[%s1723_s3 + $0x38] sm:$0xff]   ;;  %v1627_v57 = vld [vmem:[%s1724_s2] ss:$0 sm:$0xff] }
  0x14   :  { %1169 = vmatprep.subr.bf16.mxu0 %v1369_v10  ;;  %1348 = vmatprep.subr.bf16.mxu1 %v1369_v10 }
  0x17   :  { %1170 = vmatpush3.bf16.msra.mxu0 %v1370_v12  ;;  %1356 = vmatpush3.bf16.msra.mxu1 %v1370_v12 }
  0x18   :  { %1171 = vmatprep.subr.bf16.mxu0 %v1371_v13  ;;  %1349 = vmatprep.subr.bf16.mxu1 %v1371_v13 }
  0x1b   :  { %1172 = vmatpush3.bf16.msra.mxu0 %v1372_v14  ;;  %1357 = vmatpush3.bf16.msra.mxu1 %v1372_v14 }
  0x1c   :  { %1173 = vmatprep.subr.bf16.mxu0 %v1373_v15  ;;  %1350 = vmatprep.subr.bf16.mxu1 %v1373_v15 }
  0x1f   :  { %1174 = vmatpush3.bf16.msra.mxu0 %v1374_v16  ;;  %1358 = vmatpush3.bf16.msra.mxu1 %v1374_v16 }
  0x20   :  { %1295 = vmatprep.subr.bf16.mxu1 %v1423_v26 }
  0x22   :  { %378 = vmatmul.mubr.bf16.vlgmr.msra.gmra.mrb[0].mxu0 %v1375_v17  ;;  %474 = vmatmul.mubr.bf16.vlgmr.msra.gmra.mrb[0].mxu1 %v1405_v20 }
  0x23   :  { %385 = vmatprep.mubr.bf16.mxu0 %v1378_v19  ;;  %481 = vmatprep.mubr.bf16.mxu1 %v1411_v21 }
  0x24   :  { %1296 = vmatpush3.bf16.msra.mxu1 %v1423_v26 }
  0x25   :  { %1297 = vmatprep.subr.bf16.mxu1 %v1424_v27 }
  0x28   :  { %1298 = vmatpush3.bf16.msra.mxu1 %v1424_v27 }
  0x29   :  { %1299 = vmatprep.subr.bf16.mxu1 %v1425_v28 }
  0x2a   :  { %386 = vmatmul.mubr.bf16.gmra.mrb[4].mxu0 %v1380_v22  ;;  %482 = vmatmul.mubr.bf16.gmra.mrb[4].mxu1 %v1413_v24 }
  0x2b   :  { %393 = vmatprep.mubr.bf16.mxu0 %v1381_v23  ;;  %489 = vmatprep.mubr.bf16.mxu1 %v1417_v25 }
  0x2c   :  { %1300 = vmatpush3.bf16.msra.mxu1 %v1425_v28 }
  0x2d   :  { %1301 = vmatprep.subr.bf16.mxu1 %v1426_v50 }
  0x30   :  { %1302 = vmatpush3.bf16.msra.mxu1 %v1426_v50 }
  0x31   :  { %1303 = vmatprep.subr.bf16.mxu1 %v1427_v52 }
  0x32   :  { %394 = vmatmul.mubr.bf16.gmra.mrb[8].mxu0 %v1383_v29  ;;  %490 = vmatmul.mubr.bf16.gmra.mrb[8].mxu1 %v1419_v31 }
  0x33   :  { %401 = vmatprep.mubr.bf16.mxu0 %v1384_v30  ;;  %497 = vmatprep.mubr.bf16.mxu1 %v1420_v32 }
  0x34   :  { %1304 = vmatpush3.bf16.msra.mxu1 %v1427_v52 }
  0x35   :  { %1305 = vmatprep.subr.bf16.mxu1 %v1428_v53 }
  0x38   :  { %1306 = vmatpush3.bf16.msra.mxu1 %v1428_v53 }
  0x39   :  { %1307 = vmatprep.subr.bf16.mxu1 %v1429_v54 }
  0x3a   :  { %402 = vmatmul.mubr.bf16.gmra.mrb[12].mxu0 %v1386_v33  ;;  %498 = vmatmul.mubr.bf16.gmra.mrb[12].mxu1 %v1422_v35 }
  0x3b   :  { %409 = vmatprep.mubr.bf16.mxu0 %v1387_v34 }
  0x3c   :  { %1308 = vmatpush3.bf16.msra.mxu1 %v1429_v54 }
  0x3d   :  { %1309 = vmatprep.subr.bf16.mxu1 %v1430_v55 }
  0x40   :  { %1310 = vmatpush3.bf16.msra.mxu1 %v1430_v55 }
  0x42   :  { %410 = vmatmul.mubr.bf16.gmra.mrb[16].mxu0 %v1389_v36 }
  0x43   :  { %417 = vmatprep.mubr.bf16.mxu0 %v1390_v37 }
  0x4a   :  { %418 = vmatmul.mubr.bf16.gmra.mrb[20].mxu0 %v1392_v38 }
  0x4b   :  { %425 = vmatprep.mubr.bf16.mxu0 %v1393_v39 }
  0x52   :  { %426 = vmatmul.mubr.bf16.gmra.mrb[24].mxu0 %v1395_v40 }
  0x53   :  { %433 = vmatprep.mubr.bf16.mxu0 %v1396_v41 }
  0x5a   :  { %434 = vmatmul.mubr.bf16.gmra.mrb[28].mxu0 %v1398_v42 }
  0x5b   :  { %441 = vmatprep.mubr.bf16.mxu0 %v1399_v43 }
  0x62   :  { %442 = vmatmul.mubr.bf16.gmra.mrb[32].mxu0 %v1401_v44 }
  0x63   :  { %449 = vmatprep.mubr.bf16.mxu0 %v1402_v45 }
  0x6a   :  { %450 = vmatmul.mubr.bf16.gmra.mrb[36].mxu0 %v1404_v46 }
  0x6b   :  { %457 = vmatprep.mubr.bf16.mxu0 %v1408_v47 }
  0x72   :  { %458 = vmatmul.mubr.bf16.gmra.mrb[40].mxu0 %v1410_v48 }
  0x73   :  { %465 = vmatprep.mubr.bf16.mxu0 %v1414_v49 }
  0x7a   :  { %466 = vmatmul.mubr.bf16.gmra.mrb[44].mxu0 %v1416_v51 }
  0xf5   :  { %v1175_v56 = vpop.f32.mrb[0].mxu0  ;;  %v1247_v59 = vpop.f32.mrb[0].mxu1 }
  0xf6   :  { %v1176_v58 = vpop.f32.mrb[1].mxu0  ;;  %v1248_v62 = vpop.f32.mrb[1].mxu1 }
  0xf7   :  { %v1177_v60 = vadd.f32 %v1176_v58, %v1175_v56  ;;  %v1178_v61 = vpop.f32.mrb[2].mxu0  ;;  %v1249_v0 = vadd.f32 %v1248_v62, %v1247_v59  ;;  %v1250_v1 = vpop.f32.mrb[2].mxu1 }
  0xf8   :  { %v1179_v63 = vpop.f32.mrb[3].mxu0  ;;  %v1251_v4 = vpop.f32.mrb[3].mxu1 }
  0xf9   :  { %v380_v2 = vadd.f32 %v1177_v60, %v1627_v57  ;;  %v1180_v3 = vadd.f32 %v1179_v63, %v1178_v61  ;;  %v476_v5 = vadd.f32 %v1249_v0, %v1627_v57  ;;  %v1252_v6 = vadd.f32 %v1251_v4, %v1250_v1 }
  0xfb   :  { %v383_v7 = vadd.f32 %v1180_v3, %v1627_v57  ;;  %v530_v8 = vmax.f32 %v476_v5, 0.0  ;;  %v479_v9 = vadd.f32 %v1252_v6, %v1627_v57  ;;  %v506_v10 = vmax.f32 %v380_v2, 0.0 }
  0xfd   :  { %v507_v11 = vmax.f32 %v383_v7, 0.0  ;;  %v1181_v12 = vpop.f32.mrb[4].mxu0  ;;  %v531_v14 = vmax.f32 %v479_v9, 0.0  ;;  %v1253_v15 = vpop.f32.mrb[4].mxu1 }
  0xfe   :  { %v1182_v13 = vpop.f32.mrb[5].mxu0  ;;  %v1254_v19 = vpop.f32.mrb[5].mxu1 }
  0xff   :  { %v1183_v16 = vadd.f32 %v1182_v13, %v1181_v12  ;;  %v1184_v17 = vpop.f32.mrb[6].mxu0  ;;  %v538_v18 = vpack.c.bf16 %v507_v11, %v506_v10  ;;  %v1255_v21 = vadd.f32 %v1254_v19, %v1253_v15  ;;  %v1256_v22 = vpop.f32.mrb[6].mxu1  ;;  %v1633_v23 = vpack.c.bf16 %v531_v14, %v530_v8 }
 0x100   :  { %v1185_v20 = vpop.f32.mrb[7].mxu0  ;;  %v1257_v26 = vpop.f32.mrb[7].mxu1 }
 0x101   :  { %v388_v24 = vadd.f32 %v1183_v16, %v1627_v57  ;;  %v1186_v25 = vadd.f32 %v1185_v20, %v1184_v17  ;;  %1311 = vmatprep.mubr.bf16.mxu1 %v538_v18  ;;  %v484_v27 = vadd.f32 %v1255_v21, %v1627_v57  ;;  %v1258_v28 = vadd.f32 %v1257_v26, %v1256_v22 }
 0x103   :  { %v391_v29 = vadd.f32 %v1186_v25, %v1627_v57  ;;  %v532_v30 = vmax.f32 %v484_v27, 0.0  ;;  %v487_v31 = vadd.f32 %v1258_v28, %v1627_v57  ;;  %v508_v32 = vmax.f32 %v388_v24, 0.0 }
 0x105   :  { %v509_v33 = vmax.f32 %v391_v29, 0.0  ;;  %v1187_v34 = vpop.f32.mrb[8].mxu0  ;;  %v533_v36 = vmax.f32 %v487_v31, 0.0  ;;  %v1259_v37 = vpop.f32.mrb[8].mxu1 }
 0x106   :  { %v1188_v35 = vpop.f32.mrb[9].mxu0  ;;  %v1260_v41 = vpop.f32.mrb[9].mxu1 }
 0x107   :  { %v539_v38 = vpack.c.bf16 %v509_v33, %v508_v32  ;;  %v1189_v39 = vadd.f32 %v1188_v35, %v1187_v34  ;;  %v1190_v40 = vpop.f32.mrb[10].mxu0  ;;  %v1261_v43 = vadd.f32 %v1260_v41, %v1259_v37  ;;  %v1262_v44 = vpop.f32.mrb[10].mxu1  ;;  %v1639_v45 = vpack.c.bf16 %v533_v36, %v532_v30 }
 0x108   :  { %v1191_v42 = vpop.f32.mrb[11].mxu0  ;;  %v1263_v48 = vpop.f32.mrb[11].mxu1 }
 0x109   :  { %v396_v46 = vadd.f32 %v1189_v39, %v1627_v57  ;;  %v1192_v47 = vadd.f32 %v1191_v42, %v1190_v40  ;;  %1312 = vmatmul.mubr.bf16.vlgmr.msra.gmra.mrb[16].mxu1 %v539_v38  ;;  %v492_v49 = vadd.f32 %v1261_v43, %v1627_v57  ;;  %v1264_v50 = vadd.f32 %v1263_v48, %v1262_v44 }
 0x10b   :  { %v399_v51 = vadd.f32 %v1192_v47, %v1627_v57  ;;  %v534_v52 = vmax.f32 %v492_v49, 0.0  ;;  %v495_v53 = vadd.f32 %v1264_v50, %v1627_v57  ;;  %v510_v54 = vmax.f32 %v396_v46, 0.0 }
 0x10d   :  { %v511_v55 = vmax.f32 %v399_v51, 0.0  ;;  %v1193_v56 = vpop.f32.mrb[12].mxu0  ;;  %v535_v59 = vmax.f32 %v495_v53, 0.0  ;;  %v1265_v60 = vpop.f32.mrb[12].mxu1 }
 0x10e   :  { %v1194_v58 = vpop.f32.mrb[13].mxu0  ;;  %v1266_v0 = vpop.f32.mrb[13].mxu1 }
 0x10f   :  { %v1195_v61 = vadd.f32 %v1194_v58, %v1193_v56  ;;  %v1196_v62 = vpop.f32.mrb[14].mxu0  ;;  %v540_v63 = vpack.c.bf16 %v511_v55, %v510_v54  ;;  %v1267_v2 = vadd.f32 %v1266_v0, %v1265_v60  ;;  %v1268_v3 = vpop.f32.mrb[14].mxu1  ;;  %v1645_v4 = vpack.c.bf16 %v535_v59, %v534_v52 }
 0x110   :  { %v1197_v1 = vpop.f32.mrb[15].mxu0  ;;  %v1269_v7 = vpop.f32.mrb[15].mxu1 }
 0x111   :  { %v404_v5 = vadd.f32 %v1195_v61, %v1627_v57  ;;  %v1198_v6 = vadd.f32 %v1197_v1, %v1196_v62  ;;  %1315 = vmatprep.mubr.bf16.mxu1 %v540_v63  ;;  %v500_v8 = vadd.f32 %v1267_v2, %v1627_v57  ;;  %v1270_v9 = vadd.f32 %v1269_v7, %v1268_v3 }
 0x113   :  { %v407_v10 = vadd.f32 %v1198_v6, %v1627_v57  ;;  %v536_v11 = vmax.f32 %v500_v8, 0.0  ;;  %v503_v12 = vadd.f32 %v1270_v9, %v1627_v57  ;;  %v512_v13 = vmax.f32 %v404_v5, 0.0 }
 0x115   :  { %v513_v14 = vmax.f32 %v407_v10, 0.0  ;;  %v1199_v15 = vpop.f32.mrb[16].mxu0  ;;  %v537_v17 = vmax.f32 %v503_v12, 0.0 }
 0x116   :  { %v1200_v16 = vpop.f32.mrb[17].mxu0 }
 0x117   :  { %v1201_v18 = vadd.f32 %v1200_v16, %v1199_v15  ;;  %v1202_v19 = vpop.f32.mrb[18].mxu0  ;;  %v541_v20 = vpack.c.bf16 %v513_v14, %v512_v13  ;;  %v1651_v22 = vpack.c.bf16 %v537_v17, %v536_v11 }
 0x118   :  { %v1203_v21 = vpop.f32.mrb[19].mxu0 }
 0x119   :  { %v412_v24 = vadd.f32 %v1201_v18, %v1627_v57  ;;  %v1204_v25 = vadd.f32 %v1203_v21, %v1202_v19  ;;  %1316 = vmatmul.mubr.bf16.gmra.mrb[20].mxu1 %v541_v20 }
 0x11b   :  { %v415_v26 = vadd.f32 %v1204_v25, %v1627_v57  ;;  %v514_v27 = vmax.f32 %v412_v24, 0.0 }
 0x11d   :  { %v515_v28 = vmax.f32 %v415_v26, 0.0  ;;  %v1205_v29 = vpop.f32.mrb[20].mxu0 }
 0x11e   :  { %v1206_v30 = vpop.f32.mrb[21].mxu0 }
 0x11f   :  { %v1207_v31 = vadd.f32 %v1206_v30, %v1205_v29  ;;  %v1208_v32 = vpop.f32.mrb[22].mxu0  ;;  %v542_v33 = vpack.c.bf16 %v515_v28, %v514_v27 }
 0x120   :  { %v1209_v34 = vpop.f32.mrb[23].mxu0 }
 0x121   :  { %v420_v35 = vadd.f32 %v1207_v31, %v1627_v57  ;;  %v1210_v36 = vadd.f32 %v1209_v34, %v1208_v32  ;;  %1319 = vmatprep.mubr.bf16.mxu1 %v542_v33 }
 0x123   :  { %v423_v37 = vadd.f32 %v1210_v36, %v1627_v57  ;;  %v516_v38 = vmax.f32 %v420_v35, 0.0 }
 0x125   :  { %v517_v39 = vmax.f32 %v423_v37, 0.0  ;;  %v1211_v40 = vpop.f32.mrb[24].mxu0 }
 0x126   :  { %v1212_v41 = vpop.f32.mrb[25].mxu0 }
 0x127   :  { %v1213_v42 = vadd.f32 %v1212_v41, %v1211_v40  ;;  %v1214_v43 = vpop.f32.mrb[26].mxu0  ;;  %v543_v44 = vpack.c.bf16 %v517_v39, %v516_v38 }
 0x128   :  { %v1215_v46 = vpop.f32.mrb[27].mxu0 }
 0x129   :  { %v428_v47 = vadd.f32 %v1213_v42, %v1627_v57  ;;  %v1216_v48 = vadd.f32 %v1215_v46, %v1214_v43  ;;  %1320 = vmatmul.mubr.bf16.gmra.mrb[24].mxu1 %v543_v44 }
 0x12b   :  { %v431_v49 = vadd.f32 %v1216_v48, %v1627_v57  ;;  %v518_v50 = vmax.f32 %v428_v47, 0.0 }
 0x12d   :  { %v519_v51 = vmax.f32 %v431_v49, 0.0  ;;  %v1217_v52 = vpop.f32.mrb[28].mxu0 }
 0x12e   :  { %v1218_v53 = vpop.f32.mrb[29].mxu0 }
 0x12f   :  { %v1219_v54 = vadd.f32 %v1218_v53, %v1217_v52  ;;  %v1220_v55 = vpop.f32.mrb[30].mxu0  ;;  %v544_v56 = vpack.c.bf16 %v519_v51, %v518_v50 }
 0x130   :  { %v1221_v58 = vpop.f32.mrb[31].mxu0 }
 0x131   :  { %v436_v59 = vadd.f32 %v1219_v54, %v1627_v57  ;;  %v1222_v60 = vadd.f32 %v1221_v58, %v1220_v55  ;;  %1323 = vmatprep.mubr.bf16.mxu1 %v544_v56 }
 0x133   :  { %v439_v61 = vadd.f32 %v1222_v60, %v1627_v57  ;;  %v520_v62 = vmax.f32 %v436_v59, 0.0 }
 0x135   :  { %v521_v63 = vmax.f32 %v439_v61, 0.0  ;;  %v1223_v0 = vpop.f32.mrb[32].mxu0 }
 0x136   :  { %v1224_v1 = vpop.f32.mrb[33].mxu0 }
 0x137   :  { %v1225_v2 = vadd.f32 %v1224_v1, %v1223_v0  ;;  %v1226_v3 = vpop.f32.mrb[34].mxu0  ;;  %v545_v5 = vpack.c.bf16 %v521_v63, %v520_v62 }
 0x138   :  { %v1227_v6 = vpop.f32.mrb[35].mxu0 }
 0x139   :  { %v444_v7 = vadd.f32 %v1225_v2, %v1627_v57  ;;  %v1228_v8 = vadd.f32 %v1227_v6, %v1226_v3  ;;  %1324 = vmatmul.mubr.bf16.gmra.mrb[28].mxu1 %v545_v5 }
 0x13b   :  { %v447_v9 = vadd.f32 %v1228_v8, %v1627_v57  ;;  %v522_v10 = vmax.f32 %v444_v7, 0.0 }
 0x13d   :  { %v523_v11 = vmax.f32 %v447_v9, 0.0  ;;  %v1229_v12 = vpop.f32.mrb[36].mxu0 }
 0x13e   :  { %v1230_v13 = vpop.f32.mrb[37].mxu0 }
 0x13f   :  { %v1231_v14 = vadd.f32 %v1230_v13, %v1229_v12  ;;  %v1232_v15 = vpop.f32.mrb[38].mxu0  ;;  %v546_v16 = vpack.c.bf16 %v523_v11, %v522_v10 }
 0x140   :  { %v1233_v17 = vpop.f32.mrb[39].mxu0 }
 0x141   :  { %v452_v18 = vadd.f32 %v1231_v14, %v1627_v57  ;;  %v1234_v19 = vadd.f32 %v1233_v17, %v1232_v15  ;;  %1327 = vmatprep.mubr.bf16.mxu1 %v546_v16 }
 0x143   :  { %v455_v20 = vadd.f32 %v1234_v19, %v1627_v57  ;;  %v524_v21 = vmax.f32 %v452_v18, 0.0 }
 0x145   :  { %v525_v24 = vmax.f32 %v455_v20, 0.0  ;;  %v1235_v25 = vpop.f32.mrb[40].mxu0 }
 0x146   :  { %v1236_v26 = vpop.f32.mrb[41].mxu0 }
 0x147   :  { %v1237_v27 = vadd.f32 %v1236_v26, %v1235_v25  ;;  %v1238_v28 = vpop.f32.mrb[42].mxu0  ;;  %v547_v29 = vpack.c.bf16 %v525_v24, %v524_v21 }
 0x148   :  { %v1239_v30 = vpop.f32.mrb[43].mxu0 }
 0x149   :  { %v460_v31 = vadd.f32 %v1237_v27, %v1627_v57  ;;  %v1240_v32 = vadd.f32 %v1239_v30, %v1238_v28  ;;  %1328 = vmatmul.mubr.bf16.gmra.mrb[32].mxu1 %v547_v29 }
 0x14b   :  { %v463_v33 = vadd.f32 %v1240_v32, %v1627_v57  ;;  %v526_v34 = vmax.f32 %v460_v31, 0.0 }
 0x14d   :  { %v527_v35 = vmax.f32 %v463_v33, 0.0  ;;  %v1241_v36 = vpop.f32.mrb[44].mxu0 }
 0x14e   :  { %v1242_v37 = vpop.f32.mrb[45].mxu0 }
 0x14f   :  { %v1243_v38 = vadd.f32 %v1242_v37, %v1241_v36  ;;  %v1244_v39 = vpop.f32.mrb[46].mxu0  ;;  %v548_v40 = vpack.c.bf16 %v527_v35, %v526_v34 }
 0x150   :  { %v1245_v41 = vpop.f32.mrb[47].mxu0 }
 0x151   :  { %v468_v42 = vadd.f32 %v1243_v38, %v1627_v57  ;;  %v1246_v43 = vadd.f32 %v1245_v41, %v1244_v39  ;;  %1331 = vmatprep.mubr.bf16.mxu1 %v548_v40 }
 0x153   :  { %v471_v44 = vadd.f32 %v1246_v43, %v1627_v57  ;;  %v528_v46 = vmax.f32 %v468_v42, 0.0 }
 0x155   :  { %v529_v47 = vmax.f32 %v471_v44, 0.0 }
 0x157   :  { %v549_v48 = vpack.c.bf16 %v529_v47, %v528_v46 }
 0x159   :  { %1332 = vmatmul.mubr.bf16.gmra.mrb[36].mxu1 %v549_v48 }
 0x15a   :  { %1335 = vmatprep.mubr.bf16.mxu1 %v1633_v23 }
 0x161   :  { %1336 = vmatmul.mubr.bf16.gmra.mrb[40].mxu1 %v1639_v45 }
 0x162   :  { %1339 = vmatprep.mubr.bf16.mxu1 %v1645_v4 }
 0x169   :  { %1340 = vmatmul.mubr.bf16.gmra.mrb[44].mxu1 %v1651_v22 }
 0x1dc   :  { %v1313_v49 = vpop.f32.mrb[16].mxu1 }
 0x1dd   :  { %v652_v50 = vpop.f32.mrb[17].mxu1 }
 0x1de   :  { %v1314_v51 = vpop.f32.mrb[18].mxu1 }
 0x1df   :  { %v1072_v52 = vpack.c.bf16 %v1314_v51, %v1313_v49  ;;  %v655_v53 = vpop.f32.mrb[19].mxu1 }
 0x1e0   :  { %v1067_v54 = vpack.c.bf16 %v655_v53, %v652_v50 }
 0x1e1   :  { %1144 = vst [vmem:[%s1725_s4 + $0x8] sm:$0xff] %v1072_v52  }
 0x1e2   :  { %1068 = vst [vmem:[%s1725_s4] sm:$0xff] %v1067_v54  }
 0x1ec   :  { %v1317_v57 = vpop.f32.mrb[20].mxu1 }
 0x1ed   :  { %v668_v23 = vpop.f32.mrb[21].mxu1 }
 0x1ee   :  { %v1318_v45 = vpop.f32.mrb[22].mxu1 }
 0x1ef   :  { %v1082_v4 = vpack.c.bf16 %v1318_v45, %v1317_v57  ;;  %v671_v55 = vpop.f32.mrb[23].mxu1 }
 0x1f0   :  { %v1077_v22 = vpack.c.bf16 %v671_v55, %v668_v23 }
 0x1f1   :  { %1146 = vst [vmem:[%s1725_s4 + $0x18] sm:$0xff] %v1082_v4  }
 0x1f2   :  { %1145 = vst [vmem:[%s1725_s4 + $0x10] sm:$0xff] %v1077_v22  }
 0x1fc   :  { %v1321_v56 = vpop.f32.mrb[24].mxu1 }
 0x1fd   :  { %v684_v58 = vpop.f32.mrb[25].mxu1 }
 0x1fe   :  { %v1322_v59 = vpop.f32.mrb[26].mxu1 }
 0x1ff   :  { %v1092_v60 = vpack.c.bf16 %v1322_v59, %v1321_v56  ;;  %v687_v61 = vpop.f32.mrb[27].mxu1 }
 0x200   :  { %v1087_v62 = vpack.c.bf16 %v687_v61, %v684_v58 }
 0x201   :  { %1148 = vst [vmem:[%s1725_s4 + $0x28] sm:$0xff] %v1092_v60  }
 0x202   :  { %1147 = vst [vmem:[%s1725_s4 + $0x20] sm:$0xff] %v1087_v62  }
 0x20c   :  { %v1325_v63 = vpop.f32.mrb[28].mxu1 }
 0x20d   :  { %v700_v0 = vpop.f32.mrb[29].mxu1 }
 0x20e   :  { %v1326_v1 = vpop.f32.mrb[30].mxu1 }
 0x20f   :  { %v1102_v2 = vpack.c.bf16 %v1326_v1, %v1325_v63  ;;  %v703_v3 = vpop.f32.mrb[31].mxu1 }
 0x210   :  { %v1097_v5 = vpack.c.bf16 %v703_v3, %v700_v0 }
 0x211   :  { %1150 = vst [vmem:[%s1725_s4 + $0x38] sm:$0xff] %v1102_v2  }
 0x212   :  { %1149 = vst [vmem:[%s1725_s4 + $0x30] sm:$0xff] %v1097_v5  }
 0x21c   :  { %v1329_v6 = vpop.f32.mrb[32].mxu1 }
 0x21d   :  { %v716_v7 = vpop.f32.mrb[33].mxu1 }
 0x21e   :  { %v1330_v8 = vpop.f32.mrb[34].mxu1 }
 0x21f   :  { %v1112_v9 = vpack.c.bf16 %v1330_v8, %v1329_v6  ;;  %v719_v10 = vpop.f32.mrb[35].mxu1 }
 0x220   :  { %v1107_v11 = vpack.c.bf16 %v719_v10, %v716_v7 }
 0x221   :  { %1152 = vst [vmem:[%s1725_s4 + $0x48] sm:$0xff] %v1112_v9  }
 0x222   :  { %1151 = vst [vmem:[%s1725_s4 + $0x40] sm:$0xff] %v1107_v11  }
 0x22c   :  { %v1333_v12 = vpop.f32.mrb[36].mxu1 }
 0x22d   :  { %v732_v13 = vpop.f32.mrb[37].mxu1 }
 0x22e   :  { %v1334_v14 = vpop.f32.mrb[38].mxu1 }
 0x22f   :  { %v1122_v15 = vpack.c.bf16 %v1334_v14, %v1333_v12  ;;  %v735_v16 = vpop.f32.mrb[39].mxu1 }
 0x230   :  { %v1117_v17 = vpack.c.bf16 %v735_v16, %v732_v13 }
 0x231   :  { %1154 = vst [vmem:[%s1725_s4 + $0x58] sm:$0xff] %v1122_v15  }
 0x232   :  { %1153 = vst [vmem:[%s1725_s4 + $0x50] sm:$0xff] %v1117_v17  }
 0x234   :  { %v1337_v18 = vpop.f32.mrb[40].mxu1 }
 0x235   :  { %v748_v19 = vpop.f32.mrb[41].mxu1 }
 0x236   :  { %v1338_v20 = vpop.f32.mrb[42].mxu1 }
 0x237   :  { %v1132_v21 = vpack.c.bf16 %v1338_v20, %v1337_v18  ;;  %v751_v24 = vpop.f32.mrb[43].mxu1 }
 0x238   :  { %v1127_v25 = vpack.c.bf16 %v751_v24, %v748_v19 }
 0x239   :  { %1156 = vst [vmem:[%s1725_s4 + $0x68] sm:$0xff] %v1132_v21  }
 0x23a   :  { %1155 = vst [vmem:[%s1725_s4 + $0x60] sm:$0xff] %v1127_v25  }
 0x23c   :  { %v1341_v26 = vpop.f32.mrb[44].mxu1 }
 0x23d   :  { %v764_v27 = vpop.f32.mrb[45].mxu1 }
 0x23e   :  { %v1342_v28 = vpop.f32.mrb[46].mxu1 }
 0x23f   :  { %v1142_v29 = vpack.c.bf16 %v1342_v28, %v1341_v26  ;;  %v767_v30 = vpop.f32.mrb[47].mxu1 }
 0x240   :  { %v1137_v31 = vpack.c.bf16 %v767_v30, %v764_v27 }
 0x241   :  { %1158 = vst [vmem:[%s1725_s4 + $0x78] sm:$0xff] %v1142_v29  }
 0x242   :  { %1157 = vst [vmem:[%s1725_s4 + $0x70] sm:$0xff] %v1137_v31  }

</bundles_post_ra>
